<compile_context>
chip_gen: v7x
topology: tpu7x:2x2x1
jax: 0.10.0
libtpu: 0.0.40
codegen_flags: <defaults>
</compile_context>

<pallas_src>
import jax
import jax.numpy as jnp
from jax.experimental import pallas as pl
from jax.experimental.pallas import tpu as pltpu


def _conv1x1_kernel(w_ref, x_ref, o_ref):
    # One MXU matmul per grid step: (tn, C_in) @ (C_in, N*H*W) -> (tn, N*H*W)
    o_ref[...] = jnp.dot(
        w_ref[...], x_ref[...], preferred_element_type=jnp.float32
    ).astype(o_ref.dtype)


def conv1x1_pallas(x_nchw, w_oihw, *, tn=256):
    """1x1 stride-1 conv, no bias, computed as (C_out, C_in) @ (C_in, N*H*W)."""
    n, c_in, h, w = x_nchw.shape
    c_out = w_oihw.shape[0]
    assert w_oihw.shape == (c_out, c_in, 1, 1)

    # Weight as LHS: (C_out, C_in) -- plain reshape, no transpose.
    w_mat = w_oihw.reshape(c_out, c_in)

    # x as RHS: (C_in, N*H*W). For N == 1 this is a free reshape from NCHW.
    if n == 1:
        x_mat = x_nchw.reshape(c_in, h * w)
    else:
        x_mat = jnp.transpose(x_nchw, (1, 0, 2, 3)).reshape(c_in, n * h * w)
    m = x_mat.shape[1]

    if c_out % tn != 0:
        tn = c_out  # fall back to a single output tile

    # TODO(synk): optionally cast w_mat to bfloat16 (f32 accumulation kept via
    # preferred_element_type) to halve weight HBM bytes on v5e/v6e if the
    # accuracy budget allows; kept f32 here to match the reference tolerance.

    out_mat = pl.pallas_call(
        _conv1x1_kernel,
        out_shape=jax.ShapeDtypeStruct((c_out, m), x_nchw.dtype),
        grid_spec=pltpu.PrefetchScalarGridSpec(
            num_scalar_prefetch=0,
            grid=(c_out // tn,),
            in_specs=[
                # weight tile changes each step -> DMA'd exactly once in total
                pl.BlockSpec((tn, c_in), lambda j: (j, 0)),
                # x block identical every step -> stays resident in VMEM
                pl.BlockSpec((c_in, m), lambda j: (0, 0)),
            ],
            out_specs=pl.BlockSpec((tn, m), lambda j: (j, 0)),
        ),
        compiler_params=pltpu.CompilerParams(
            dimension_semantics=("parallel",),
        ),
        cost_estimate=pl.CostEstimate(
            flops=2 * c_out * c_in * m,
            transcendentals=0,
            bytes_accessed=(c_out * c_in + c_in * m + c_out * m)
            * x_nchw.dtype.itemsize,
        ),
    )(w_mat, x_mat)

    # (C_out, N*H*W) -> NCHW; free reshape for N == 1.
    if n == 1:
        out = out_mat.reshape(1, c_out, h, w)
    else:
        out = out_mat.reshape(c_out, n, h, w).transpose(1, 0, 2, 3)
    return out


if __name__ == "__main__":
    key = jax.random.PRNGKey(0)
    k_x, k_w = jax.random.split(key)

    # Module-implied shapes: Conv2d(1024, 512, kernel_size=1, bias=False),
    # input x250: (1, 1024, 14, 14)
    N, C_IN, H, W = 1, 1024, 14, 14
    C_OUT = 512

    x = jax.random.normal(k_x, (N, C_IN, H, W), dtype=jnp.float32)
    bound = (1.0 / C_IN) ** 0.5
    w = jax.random.uniform(
        k_w, (C_OUT, C_IN, 1, 1), dtype=jnp.float32, minval=-bound, maxval=bound
    )

    out = conv1x1_pallas(x, w)
    jax.block_until_ready(out)

    # sanity-check against plain JAX reference (same semantics as nn.Conv2d 1x1)
    ref = jnp.einsum("nchw,oc->nohw", x, w.reshape(C_OUT, C_IN))
    assert out.shape == (N, C_OUT, H, W)
    assert jnp.allclose(out, ref, atol=1e-4, rtol=1e-4)

    print("KERNEL_OK")
</pallas_src>

<mosaic_0001>
module attributes {stable_mosaic.version = 11 : i64} {
  func.func @_conv1x1_kernel(%arg0: i32, %arg1: memref<256x1024xf32, #tpu.memory_space<vmem>>, %arg2: memref<1024x196xf32, #tpu.memory_space<vmem>>, %arg3: memref<256x196xf32, #tpu.memory_space<vmem>>) attributes {dimension_semantics = [#tpu.dimension_semantics<parallel>], iteration_bounds = array<i64: 2>, scalar_prefetch = 0 : i64, scratch_operands = 0 : i64, tpu.core_type = #tpu.core_type<tc>, window_params = [{transform_indices = @transform_0, window_bounds = array<i64: 256, 1024>}, {pipeline_mode = #tpu.pipeline_mode<synchronous>, transform_indices = @transform_1, window_bounds = array<i64: 1024, 196>}, {transform_indices = @transform_2, window_bounds = array<i64: 256, 196>}]} {
    %c0 = arith.constant 0 : index
    %c0_0 = arith.constant 0 : index
    %0 = vector.load %arg1[%c0, %c0_0] : memref<256x1024xf32, #tpu.memory_space<vmem>>, vector<256x1024xf32>
    %c0_1 = arith.constant 0 : index
    %c0_2 = arith.constant 0 : index
    %1 = vector.load %arg2[%c0_1, %c0_2] : memref<1024x196xf32, #tpu.memory_space<vmem>>, vector<1024x196xf32>
    %cst = arith.constant dense<0.000000e+00> : vector<256x196xf32>
    %2 = tpu.matmul %0, %1, %cst {dimension_numbers = #tpu.dot_dimension_numbers<[1], [0], [0], [1], [0, 0, 1, 1], [], []>} : vector<256x1024xf32>, vector<1024x196xf32>, vector<256x196xf32> -> vector<256x196xf32>
    %c0_3 = arith.constant 0 : index
    %c0_4 = arith.constant 0 : index
    %3 = vector.load %arg3[%c0_3, %c0_4] : memref<256x196xf32, #tpu.memory_space<vmem>>, vector<256x196xf32>
    tpu.vector_store %arg3[%c0_3, %c0_4], %2 {strides = array<i32>} : memref<256x196xf32, #tpu.memory_space<vmem>>, vector<256x196xf32>,
    return
  }
  func.func @transform_0(%arg0: i32) -> (i32, i32) {
    %c0_i32 = arith.constant 0 : i32
    %c0_i32_0 = arith.constant 0 : i32
    return %arg0, %c0_i32 : i32, i32
  }
  func.func @transform_1(%arg0: i32) -> (i32, i32) {
    %c0_i32 = arith.constant 0 : i32
    %c0_i32_0 = arith.constant 0 : i32
    %c0_i32_1 = arith.constant 0 : i32
    return %c0_i32, %c0_i32_0 : i32, i32
  }
  func.func @transform_2(%arg0: i32) -> (i32, i32) {
    %c0_i32 = arith.constant 0 : i32
    %c0_i32_0 = arith.constant 0 : i32
    return %arg0, %c0_i32 : i32, i32
  }
}

</mosaic_0001>

<bundles_post_ra>
// kernel: tpu_custom_call.1
= control target key start
LH: loop header
LB: loop body
LE: loop exit
PB: predicated region body
PF: predicated region fallthrough
CT: control target
= control target key end

     0   :  { %7 = vsyncpa [#allocation3], 0  ;;  %s3665_s0 = inlined_call_operand.hbm [shape: f32[512,1024], index: 0, kind: input, shape index: {}]   ;;  %s3666_s1 = inlined_call_operand.vmem [shape: f32[1024,196], index: 1, kind: input, shape index: {}]   ;;  %s3667_s2 = inlined_call_operand.vmem [shape: f32[512,196], index: 2, kind: output, shape index: {}]  }
   0x1   :  { %9 = vsyncpa [#allocation3 + $0x1], 0  ;;  %s2434_s9 = smov 0   ;;  %s2436_s10 = smov 0  }
   0x2   :  { %s2438_s11 = smov 0   ;;  %s2440_s12 = smov 0  }
   0x3 LB: > { %s1843_s13 = sadd.s32 4294967295, %s2414_s12   ;;  %s2454_s14 = sadd.s32 1, %s2414_s12   ;;  %s2414_s12 = sphi %s2440_s12, %s3674_s12   ;;  %s2410_s11 = sphi %s2438_s11, %s3673_s11   ;;  %s2406_s10 = sphi %s2436_s10, %s3672_s10   ;;  %s2402_s9 = sphi %s2434_s9, %s3671_s9  }
   0x4   : > { %s19_s15 = ssub.s32 %s2414_s12, %s2454_s14  ;;  %s22_s16 = sadd.s32 1, %s2410_s11 }
   0x5   : > { %p20_p0 = scmp.eq.s32.totalorder %s19_s15, 0  ;;  %p29_p1 = scmp.ne.s32.totalorder %s2410_s11, %s2406_s10 }
   0x6   : > { %p30_p2 = scmp.eq.s32.totalorder %s2414_s12, 0  ;;  %p35_p3 = scmp.ne.s32.totalorder %s2406_s10, %s2402_s9 }
   0x7   : > { %s2464_s17 = scalar_select %p20_p0, %s2410_s11, %s22_s16  }
   0x8   : > { %p31_p4 = por %p30_p2, %p29_p1  ;;  %p36_p5 = scmp.eq.s32.totalorder %s1843_s13, 0 }
   0x9   : > { %p2315_p6 = scmp.lt.s32.totalorder %s2414_s12, 2  ;;  %s109_s19 = sand.u32 1, %s2410_s11  }
   0xa   : > { %p2469_p7 = por %p36_p5, %p35_p3  ;;  %s1847_s20 = sshll.u32 %s109_s19, 11 }
   0xb   : > { %s1859_s21 = sshll.u32 %s2414_s12, 15  ;;  %s113_s25 = scalar_lea.vmem [#allocation2], %s1847_s20 }
   0xc   : > { %s2478_s24 = scalar_lea.hbm %s3665_s0, %s1859_s21  ;;  %s121_s26 = sshll.u32 %s113_s25, 4  ;;  %s2480_s26 = int_to_ptr.vmem [resolvable:$true] %s121_s26 }
   0xd   : > { %p2482_p8 = pnand %p2315_p6, %p31_p4  ;;  %s2487_s28 = scalar_lea.sflag [#allocation3], %s109_s19 }
   0xe   : > { %s2350_s29 = scalar_lea.hbm %s2478_s24, 32768  ;;  %s2355_s4 = scalar_lea.hbm %s3665_s0, 65536 }
   0xf   : > { %p2351_p10 = scmp.ne.s32.totalorder %s2478_s24, %s2350_s29  ;;  %p2352_p11 = pneg %p2482_p8 }
  0x10   : > { %p2356_p0 = scmp.lt.u32.totalorder %s2478_s24, %s3665_s0  ;;  %p2357_p1 = scmp.lt.u32.totalorder %s2355_s4, %s2350_s29 }
  0x11   : > { %p2353_p12 = pnand %p2352_p11, %p2351_p10  ;;  %p2359_p3 = scmp.lt.u32.totalorder %s2350_s29, %s2478_s24 }
  0x12   : > { %p2358_p2 = por %p2357_p1, %p2356_p0 }
  0x13   : > { %p2354_p13 = pneg %p2353_p12 }
  0x14   : > { %p2360_p4 = por %p2359_p3, %p2358_p2 }
  0x16   : > { %p2361_p5 = pnand %p2360_p4, %p2354_p13 }
  0x18   : > { %2364 = shalt.err (!%p2361_p5)
}
  0x19   : > { %s2365_s7 = scalar_lea.vmem %s2480_s26, 32768  ;;  %s2416_s8 = smov [#allocation2]  }
  0x1a   : > { %p2366_p6 = scmp.ne.s32.totalorder %s2480_s26, %s2365_s7  ;;  %s2370_s9 = sshll.u32 %s2416_s8, 4  ;;  %s2371_s9 = int_to_ptr.vmem [resolvable:$false] %s2370_s9 }
  0x1b   : > { %s2372_s15 = scalar_lea.vmem %s2371_s9, 65536  ;;  %p2373_p9 = scmp.lt.s32.totalorder %s2480_s26, %s2371_s9 }
  0x1c   : > { %p2368_p10 = pnand %p2366_p6, %p2352_p11  ;;  %p2374_p0 = scmp.lt.s32.totalorder %s2372_s15, %s2365_s7 }
  0x1e   : > { %p2369_p12 = pneg %p2368_p10  ;;  %p2375_p1 = por %p2374_p0, %p2373_p9 }
  0x20   : > { %p2376_p2 = pnand %p2375_p1, %p2369_p12 }
  0x22   : > { %2379 = shalt.err (!%p2376_p2)
}
  0x23   : > { %s2417_s16 = smov 1024   ;;  %s2418_s19 = smov 64  }
  0x24   : > { %2314 = dma.hbm_to_vmem [thread:$0]  (!%p2482_p8), %s2478_s24, 32768, %s2480_s26, %s2487_s28, %s2417_s16, %s2417_s16, %s2418_s19  }
  0x25   : > { %p129_p11 = scmp.lt.s32.totalorder %s2414_s12, 3  ;;  %p3670_p13 = scmp.ge.s32.totalorder %s2414_s12, 1 }
  0x27   : > { %p130_p3 = pnand %p3670_p13, %p129_p11 }
  0x28   : > { %s135_s20 = sand.u32 (!%p130_p3), 1, %s2406_s10  }
  0x29   : > { %133 = sbr.rel (%p130_p3) target bundleno = 586 (0x24a), region = 28  ;;  %s1852_s21 = sshll.u32 (!%p130_p3), %s135_s20, 11 }
  0x2a   : > { %s136_s22 = scalar_lea.sflag (!%p130_p3), [#allocation3], %s135_s20  ;;  %s2519_s23 = scalar_lea.vmem (!%p130_p3), [#allocation2], %s1852_s21 }
  0x30   : > { %2397 = dma.done.wait (%p2469_p7), %s136_s22, 32768  }
  0x31   : > { %2399 = vsyncadd (%p2469_p7), %s136_s22, 4294934528  ;;  %v426_v0 = vld [vmem:[%s3666_s1 + $0x8] sm:$0xff]  ;;  %v428_v1 = vld [vmem:[%s3666_s1 + $0x18] sm:$0xff]  ;;  %s1853_s4 = sshll.u32 %s1843_s13, 5  ;;  %vm1710_vm0 = vcmask 556032  }
  0x32   : > { %v554_v2 = vld [vmem:[%s3666_s1 + $0x408] sm:$0xff]  ;;  %v1861_v3 = vpack.c.bf16 %v428_v1, %v426_v0  ;;  %v556_v4 = vld [vmem:[%s3666_s1 + $0x418] sm:$0xff]  ;;  %v425_v5 = vld [vmem:[%s3666_s1] sm:$0xff]  ;;  %p163_p7 = scmp.lt.s32.totalorder %s1853_s4, 63 }
  0x33   : > { %v427_v6 = vld [vmem:[%s3666_s1 + $0x10] sm:$0xff]  ;;  %v1989_v7 = vpack.c.bf16 %v556_v4, %v554_v2  ;;  %v553_v9 = vld [vmem:[%s3666_s1 + $0x400] sm:$0xff]  ;;  %v430_v11 = vld [vmem:[%s3666_s1 + $0x28] sm:$0xff] }
  0x34   : > { %v1863_v8 = vpack.c.bf16 %v427_v6, %v425_v5  ;;  %v555_v10 = vld [vmem:[%s3666_s1 + $0x410] sm:$0xff]  ;;  %1862 = vmatprep.subr.bf16.mxu1 %v1861_v3  ;;  %v432_v13 = vld [vmem:[%s3666_s1 + $0x38] sm:$0xff]  ;;  %v558_v14 = vld [vmem:[%s3666_s1 + $0x428] sm:$0xff]  ;;  %s3676_s4 = smov (!%p163_p7, %s1853_s4), 63 }
  0x35   : > { %v1991_v12 = vpack.c.bf16 %v555_v10, %v553_v9  ;;  %v560_v15 = vld [vmem:[%s3666_s1 + $0x438] sm:$0xff]  ;;  %1990 = vmatprep.subr.bf16.mxu0 %v1989_v7  ;;  %v1865_v16 = vpack.c.bf16 %v432_v13, %v430_v11  ;;  %v429_v18 = vld [vmem:[%s3666_s1 + $0x20] sm:$0xff]  ;;  %v431_v19 = vld [vmem:[%s3666_s1 + $0x30] sm:$0xff]  ;;  %s1860_s18 = sshll.u32 %s3676_s4, 4 }
  0x36   : > { %1864 = vmatpush1.bf16.msra.mxu1 %v1863_v8  ;;  %v1993_v17 = vpack.c.bf16 %v560_v15, %v558_v14  ;;  %v557_v20 = vld [vmem:[%s3666_s1 + $0x420] sm:$0xff]  ;;  %v1867_v21 = vpack.c.bf16 %v431_v19, %v429_v18  ;;  %v559_v22 = vld [vmem:[%s3666_s1 + $0x430] sm:$0xff]  ;;  %v434_v23 = vld [vmem:[%s3666_s1 + $0x48] sm:$0xff]  ;;  %s3554_s7 = scalar_lea.vmem %s3667_s2, %s1860_s18 }
  0x37   : > { %1992 = vmatpush1.bf16.msra.mxu0 %v1991_v12  ;;  %v436_v24 = vld [vmem:[%s3666_s1 + $0x58] sm:$0xff]  ;;  %1866 = vmatprep.subr.bf16.mxu1 %v1865_v16  ;;  %v1995_v25 = vpack.c.bf16 %v559_v22, %v557_v20  ;;  %v562_v27 = vld [vmem:[%s3666_s1 + $0x448] sm:$0xff]  ;;  %v433_v29 = vld [vmem:[%s3666_s1 + $0x40] sm:$0xff] }
  0x38   : > { %1994 = vmatprep.subr.bf16.mxu0 %v1993_v17  ;;  %v1869_v26 = vpack.c.bf16 %v436_v24, %v434_v23  ;;  %v564_v28 = vld [vmem:[%s3666_s1 + $0x458] sm:$0xff]  ;;  %v435_v31 = vld [vmem:[%s3666_s1 + $0x50] sm:$0xff]  ;;  %v561_v32 = vld [vmem:[%s3666_s1 + $0x440] sm:$0xff] }
  0x39   : > { %v1997_v30 = vpack.c.bf16 %v564_v28, %v562_v27  ;;  %v563_v33 = vld [vmem:[%s3666_s1 + $0x450] sm:$0xff]  ;;  %v1871_v34 = vpack.c.bf16 %v435_v31, %v433_v29  ;;  %v438_v35 = vld [vmem:[%s3666_s1 + $0x68] sm:$0xff]  ;;  %v440_v36 = vld [vmem:[%s3666_s1 + $0x78] sm:$0xff] }
  0x3a   : > { %1868 = vmatpush1.bf16.msra.mxu1 %v1867_v21  ;;  %v566_v37 = vld [vmem:[%s3666_s1 + $0x468] sm:$0xff]  ;;  %v1999_v38 = vpack.c.bf16 %v563_v33, %v561_v32  ;;  %v1873_v39 = vpack.c.bf16 %v440_v36, %v438_v35  ;;  %v568_v40 = vld [vmem:[%s3666_s1 + $0x478] sm:$0xff]  ;;  %v437_v41 = vld [vmem:[%s3666_s1 + $0x60] sm:$0xff] }
  0x3b   : > { %1996 = vmatpush1.bf16.msra.mxu0 %v1995_v25  ;;  %1870 = vmatprep.subr.bf16.mxu1 %v1869_v26  ;;  %v439_v42 = vld [vmem:[%s3666_s1 + $0x70] sm:$0xff]  ;;  %v2001_v43 = vpack.c.bf16 %v568_v40, %v566_v37  ;;  %v565_v44 = vld [vmem:[%s3666_s1 + $0x460] sm:$0xff]  ;;  %v442_v46 = vld [vmem:[%s3666_s1 + $0x88] sm:$0xff] }
  0x3c   : > { %1998 = vmatprep.subr.bf16.mxu0 %v1997_v30  ;;  %v567_v45 = vld [vmem:[%s3666_s1 + $0x470] sm:$0xff]  ;;  %v444_v47 = vld [vmem:[%s3666_s1 + $0x98] sm:$0xff]  ;;  %v570_v48 = vld [vmem:[%s3666_s1 + $0x488] sm:$0xff]  ;;  %v1875_v50 = vpack.c.bf16 %v439_v42, %v437_v41 }
  0x3d   : > { %v572_v49 = vld [vmem:[%s3666_s1 + $0x498] sm:$0xff]  ;;  %v2003_v51 = vpack.c.bf16 %v567_v45, %v565_v44  ;;  %v1877_v52 = vpack.c.bf16 %v444_v47, %v442_v46  ;;  %v441_v53 = vld [vmem:[%s3666_s1 + $0x80] sm:$0xff]  ;;  %v443_v54 = vld [vmem:[%s3666_s1 + $0x90] sm:$0xff] }
  0x3e   : > { %1872 = vmatpush1.bf16.msra.mxu1 %v1871_v34  ;;  %v569_v55 = vld [vmem:[%s3666_s1 + $0x480] sm:$0xff]  ;;  %v2005_v56 = vpack.c.bf16 %v572_v49, %v570_v48  ;;  %v571_v57 = vld [vmem:[%s3666_s1 + $0x490] sm:$0xff]  ;;  %v446_v58 = vld [vmem:[%s3666_s1 + $0xa8] sm:$0xff]  ;;  %v1879_v62 = vpack.c.bf16 %v443_v54, %v441_v53 }
  0x3f   : > { %2000 = vmatpush1.bf16.msra.mxu0 %v1999_v38  ;;  %1874 = vmatprep.subr.bf16.mxu1 %v1873_v39  ;;  %v448_v59 = vld [vmem:[%s3666_s1 + $0xb8] sm:$0xff]  ;;  %v574_v60 = vld [vmem:[%s3666_s1 + $0x4a8] sm:$0xff]  ;;  %v2007_v63 = vpack.c.bf16 %v571_v57, %v569_v55  ;;  %v445_v1 = vld [vmem:[%s3666_s1 + $0xa0] sm:$0xff] }
  0x40   : > { %2002 = vmatprep.subr.bf16.mxu0 %v2001_v43  ;;  %v576_v61 = vld [vmem:[%s3666_s1 + $0x4b8] sm:$0xff]  ;;  %v1881_v0 = vpack.c.bf16 %v448_v59, %v446_v58  ;;  %v447_v2 = vld [vmem:[%s3666_s1 + $0xb0] sm:$0xff]  ;;  %v573_v3 = vld [vmem:[%s3666_s1 + $0x4a0] sm:$0xff] }
  0x41   : > { %v2009_v4 = vpack.c.bf16 %v576_v61, %v574_v60  ;;  %v575_v5 = vld [vmem:[%s3666_s1 + $0x4b0] sm:$0xff]  ;;  %v450_v6 = vld [vmem:[%s3666_s1 + $0xc8] sm:$0xff]  ;;  %v452_v7 = vld [vmem:[%s3666_s1 + $0xd8] sm:$0xff]  ;;  %v1883_v10 = vpack.c.bf16 %v447_v2, %v445_v1 }
  0x42   : > { %1876 = vmatpush1.bf16.msra.mxu1 %v1875_v50  ;;  %v578_v8 = vld [vmem:[%s3666_s1 + $0x4c8] sm:$0xff]  ;;  %v580_v9 = vld [vmem:[%s3666_s1 + $0x4d8] sm:$0xff]  ;;  %v2011_v11 = vpack.c.bf16 %v575_v5, %v573_v3  ;;  %v1885_v12 = vpack.c.bf16 %v452_v7, %v450_v6  ;;  %v449_v13 = vld [vmem:[%s3666_s1 + $0xc0] sm:$0xff] }
  0x43   : > { %2004 = vmatpush1.bf16.msra.mxu0 %v2003_v51  ;;  %1878 = vmatprep.subr.bf16.mxu1 %v1877_v52  ;;  %v451_v14 = vld [vmem:[%s3666_s1 + $0xd0] sm:$0xff]  ;;  %v577_v15 = vld [vmem:[%s3666_s1 + $0x4c0] sm:$0xff]  ;;  %v2013_v16 = vpack.c.bf16 %v580_v9, %v578_v8  ;;  %v454_v18 = vld [vmem:[%s3666_s1 + $0xe8] sm:$0xff] }
  0x44   : > { %2006 = vmatprep.subr.bf16.mxu0 %v2005_v56  ;;  %v579_v17 = vld [vmem:[%s3666_s1 + $0x4d0] sm:$0xff]  ;;  %v456_v19 = vld [vmem:[%s3666_s1 + $0xf8] sm:$0xff]  ;;  %v582_v20 = vld [vmem:[%s3666_s1 + $0x4e8] sm:$0xff]  ;;  %v1887_v22 = vpack.c.bf16 %v451_v14, %v449_v13 }
  0x45   : > { %v584_v21 = vld [vmem:[%s3666_s1 + $0x4f8] sm:$0xff]  ;;  %v2015_v23 = vpack.c.bf16 %v579_v17, %v577_v15  ;;  %v1889_v24 = vpack.c.bf16 %v456_v19, %v454_v18  ;;  %v453_v25 = vld [vmem:[%s3666_s1 + $0xe0] sm:$0xff]  ;;  %v455_v26 = vld [vmem:[%s3666_s1 + $0xf0] sm:$0xff] }
  0x46   : > { %1880 = vmatpush1.bf16.msra.mxu1 %v1879_v62  ;;  %v581_v27 = vld [vmem:[%s3666_s1 + $0x4e0] sm:$0xff]  ;;  %v2017_v28 = vpack.c.bf16 %v584_v21, %v582_v20  ;;  %v583_v29 = vld [vmem:[%s3666_s1 + $0x4f0] sm:$0xff]  ;;  %v458_v30 = vld [vmem:[%s3666_s1 + $0x108] sm:$0xff]  ;;  %v1891_v34 = vpack.c.bf16 %v455_v26, %v453_v25 }
  0x47   : > { %2008 = vmatpush1.bf16.msra.mxu0 %v2007_v63  ;;  %1882 = vmatprep.subr.bf16.mxu1 %v1881_v0  ;;  %v460_v31 = vld [vmem:[%s3666_s1 + $0x118] sm:$0xff]  ;;  %v586_v32 = vld [vmem:[%s3666_s1 + $0x508] sm:$0xff]  ;;  %v2019_v35 = vpack.c.bf16 %v583_v29, %v581_v27  ;;  %v457_v37 = vld [vmem:[%s3666_s1 + $0x100] sm:$0xff] }
  0x48   : > { %2010 = vmatprep.subr.bf16.mxu0 %v2009_v4  ;;  %v588_v33 = vld [vmem:[%s3666_s1 + $0x518] sm:$0xff]  ;;  %v1893_v36 = vpack.c.bf16 %v460_v31, %v458_v30  ;;  %v459_v38 = vld [vmem:[%s3666_s1 + $0x110] sm:$0xff]  ;;  %v585_v39 = vld [vmem:[%s3666_s1 + $0x500] sm:$0xff] }
  0x49   : > { %v2021_v40 = vpack.c.bf16 %v588_v33, %v586_v32  ;;  %v587_v41 = vld [vmem:[%s3666_s1 + $0x510] sm:$0xff]  ;;  %v462_v42 = vld [vmem:[%s3666_s1 + $0x128] sm:$0xff]  ;;  %v464_v43 = vld [vmem:[%s3666_s1 + $0x138] sm:$0xff]  ;;  %v1895_v46 = vpack.c.bf16 %v459_v38, %v457_v37 }
  0x4a   : > { %1884 = vmatpush1.bf16.msra.mxu1 %v1883_v10  ;;  %v590_v44 = vld [vmem:[%s3666_s1 + $0x528] sm:$0xff]  ;;  %v592_v45 = vld [vmem:[%s3666_s1 + $0x538] sm:$0xff]  ;;  %v2023_v47 = vpack.c.bf16 %v587_v41, %v585_v39  ;;  %v1897_v48 = vpack.c.bf16 %v464_v43, %v462_v42  ;;  %v461_v49 = vld [vmem:[%s3666_s1 + $0x120] sm:$0xff] }
  0x4b   : > { %2012 = vmatpush1.bf16.msra.mxu0 %v2011_v11  ;;  %1886 = vmatprep.subr.bf16.mxu1 %v1885_v12  ;;  %v463_v50 = vld [vmem:[%s3666_s1 + $0x130] sm:$0xff]  ;;  %v589_v51 = vld [vmem:[%s3666_s1 + $0x520] sm:$0xff]  ;;  %v2025_v52 = vpack.c.bf16 %v592_v45, %v590_v44  ;;  %v466_v54 = vld [vmem:[%s3666_s1 + $0x148] sm:$0xff] }
  0x4c   : > { %2014 = vmatprep.subr.bf16.mxu0 %v2013_v16  ;;  %v591_v53 = vld [vmem:[%s3666_s1 + $0x530] sm:$0xff]  ;;  %v468_v55 = vld [vmem:[%s3666_s1 + $0x158] sm:$0xff]  ;;  %v594_v56 = vld [vmem:[%s3666_s1 + $0x548] sm:$0xff]  ;;  %v1899_v58 = vpack.c.bf16 %v463_v50, %v461_v49 }
  0x4d   : > { %v596_v57 = vld [vmem:[%s3666_s1 + $0x558] sm:$0xff]  ;;  %v2027_v59 = vpack.c.bf16 %v591_v53, %v589_v51  ;;  %v1901_v60 = vpack.c.bf16 %v468_v55, %v466_v54  ;;  %v465_v61 = vld [vmem:[%s3666_s1 + $0x140] sm:$0xff]  ;;  %v467_v62 = vld [vmem:[%s3666_s1 + $0x150] sm:$0xff] }
  0x4e   : > { %1888 = vmatpush1.bf16.msra.mxu1 %v1887_v22  ;;  %v593_v63 = vld [vmem:[%s3666_s1 + $0x540] sm:$0xff]  ;;  %v2029_v0 = vpack.c.bf16 %v596_v57, %v594_v56  ;;  %v595_v1 = vld [vmem:[%s3666_s1 + $0x550] sm:$0xff]  ;;  %v470_v2 = vld [vmem:[%s3666_s1 + $0x168] sm:$0xff]  ;;  %v1903_v6 = vpack.c.bf16 %v467_v62, %v465_v61 }
  0x4f   : > { %2016 = vmatpush1.bf16.msra.mxu0 %v2015_v23  ;;  %1890 = vmatprep.subr.bf16.mxu1 %v1889_v24  ;;  %v472_v3 = vld [vmem:[%s3666_s1 + $0x178] sm:$0xff]  ;;  %v598_v4 = vld [vmem:[%s3666_s1 + $0x568] sm:$0xff]  ;;  %v469_v7 = vld [vmem:[%s3666_s1 + $0x160] sm:$0xff]  ;;  %v2031_v8 = vpack.c.bf16 %v595_v1, %v593_v63 }
  0x50   : > { %2018 = vmatprep.subr.bf16.mxu0 %v2017_v28  ;;  %v600_v5 = vld [vmem:[%s3666_s1 + $0x578] sm:$0xff]  ;;  %v1905_v9 = vpack.c.bf16 %v472_v3, %v470_v2  ;;  %v471_v10 = vld [vmem:[%s3666_s1 + $0x170] sm:$0xff]  ;;  %v597_v11 = vld [vmem:[%s3666_s1 + $0x560] sm:$0xff] }
  0x51   : > { %v599_v12 = vld [vmem:[%s3666_s1 + $0x570] sm:$0xff]  ;;  %v2033_v13 = vpack.c.bf16 %v600_v5, %v598_v4  ;;  %v474_v14 = vld [vmem:[%s3666_s1 + $0x188] sm:$0xff]  ;;  %v476_v15 = vld [vmem:[%s3666_s1 + $0x198] sm:$0xff]  ;;  %v1907_v20 = vpack.c.bf16 %v471_v10, %v469_v7 }
  0x52   : > { %1892 = vmatpush1.bf16.msra.mxu1 %v1891_v34  ;;  %v170_v16 = vld [vmem:[%s2519_s23 + $0x8] sm:$0xff]  ;;  %v604_v18 = vld [vmem:[%s3666_s1 + $0x598] sm:$0xff]  ;;  %v2035_v21 = vpack.c.bf16 %v599_v12, %v597_v11  ;;  %v1909_v22 = vpack.c.bf16 %v476_v15, %v474_v14  ;;  %v473_v23 = vld [vmem:[%s3666_s1 + $0x180] sm:$0xff] }
  0x53   : > { %2020 = vmatpush1.bf16.msra.mxu0 %v2019_v35  ;;  %1894 = vmatprep.subr.bf16.mxu1 %v1893_v36  ;;  %v602_v17 = vld [vmem:[%s3666_s1 + $0x588] sm:$0xff]  ;;  %v475_v24 = vld [vmem:[%s3666_s1 + $0x190] sm:$0xff]  ;;  %v601_v25 = vld [vmem:[%s3666_s1 + $0x580] sm:$0xff] }
  0x54   : > { %2022 = vmatprep.subr.bf16.mxu0 %v2021_v40  ;;  %745 = vmatprep.mubr.f32.mxu1 %v170_v16  ;;  %v174_v19 = vld [vmem:[%s2519_s23 + $0x28] sm:$0xff]  ;;  %v2037_v26 = vpack.c.bf16 %v604_v18, %v602_v17  ;;  %v603_v27 = vld [vmem:[%s3666_s1 + $0x590] sm:$0xff]  ;;  %v480_v29 = vld [vmem:[%s3666_s1 + $0x1b8] sm:$0xff]  ;;  %v1911_v32 = vpack.c.bf16 %v475_v24, %v473_v23 }
  0x55   : > { %1259 = vmatprep.mubr.f32.mxu0 %v174_v19  ;;  %v478_v28 = vld [vmem:[%s3666_s1 + $0x1a8] sm:$0xff]  ;;  %v608_v31 = vld [vmem:[%s3666_s1 + $0x5b8] sm:$0xff]  ;;  %v2039_v33 = vpack.c.bf16 %v603_v27, %v601_v25  ;;  %v477_v35 = vld [vmem:[%s3666_s1 + $0x1a0] sm:$0xff] }
  0x56   : > { %1896 = vmatpush1.bf16.msra.mxu1 %v1895_v46  ;;  %v606_v30 = vld [vmem:[%s3666_s1 + $0x5a8] sm:$0xff]  ;;  %v1913_v34 = vpack.c.bf16 %v480_v29, %v478_v28  ;;  %v479_v36 = vld [vmem:[%s3666_s1 + $0x1b0] sm:$0xff]  ;;  %v605_v37 = vld [vmem:[%s3666_s1 + $0x5a0] sm:$0xff] }
  0x57   : > { %2024 = vmatpush1.bf16.msra.mxu0 %v2023_v47  ;;  %1898 = vmatprep.subr.bf16.mxu1 %v1897_v48  ;;  %v2041_v38 = vpack.c.bf16 %v608_v31, %v606_v30  ;;  %v607_v39 = vld [vmem:[%s3666_s1 + $0x5b0] sm:$0xff]  ;;  %v482_v40 = vld [vmem:[%s3666_s1 + $0x1c8] sm:$0xff]  ;;  %v484_v41 = vld [vmem:[%s3666_s1 + $0x1d8] sm:$0xff]  ;;  %v1915_v44 = vpack.c.bf16 %v479_v36, %v477_v35 }
  0x58   : > { %2026 = vmatprep.subr.bf16.mxu0 %v2025_v52  ;;  %v610_v42 = vld [vmem:[%s3666_s1 + $0x5c8] sm:$0xff]  ;;  %v612_v43 = vld [vmem:[%s3666_s1 + $0x5d8] sm:$0xff]  ;;  %v2043_v45 = vpack.c.bf16 %v607_v39, %v605_v37  ;;  %v1917_v46 = vpack.c.bf16 %v484_v41, %v482_v40  ;;  %v481_v47 = vld [vmem:[%s3666_s1 + $0x1c0] sm:$0xff] }
  0x59   : > { %v483_v48 = vld [vmem:[%s3666_s1 + $0x1d0] sm:$0xff]  ;;  %v609_v49 = vld [vmem:[%s3666_s1 + $0x5c0] sm:$0xff]  ;;  %v2045_v50 = vpack.c.bf16 %v612_v43, %v610_v42  ;;  %v486_v52 = vld [vmem:[%s3666_s1 + $0x1e8] sm:$0xff] }
  0x5a   : > { %1900 = vmatpush1.bf16.msra.mxu1 %v1899_v58  ;;  %v611_v51 = vld [vmem:[%s3666_s1 + $0x5d0] sm:$0xff]  ;;  %v488_v53 = vld [vmem:[%s3666_s1 + $0x1f8] sm:$0xff]  ;;  %v614_v54 = vld [vmem:[%s3666_s1 + $0x5e8] sm:$0xff]  ;;  %v1919_v56 = vpack.c.bf16 %v483_v48, %v481_v47 }
  0x5b   : > { %2028 = vmatpush1.bf16.msra.mxu0 %v2027_v59  ;;  %1902 = vmatprep.subr.bf16.mxu1 %v1901_v60  ;;  %v616_v55 = vld [vmem:[%s3666_s1 + $0x5f8] sm:$0xff]  ;;  %v2047_v57 = vpack.c.bf16 %v611_v51, %v609_v49  ;;  %v1921_v58 = vpack.c.bf16 %v488_v53, %v486_v52  ;;  %v485_v59 = vld [vmem:[%s3666_s1 + $0x1e0] sm:$0xff]  ;;  %v487_v60 = vld [vmem:[%s3666_s1 + $0x1f0] sm:$0xff] }
  0x5c   : > { %2030 = vmatprep.subr.bf16.mxu0 %v2029_v0  ;;  %v613_v61 = vld [vmem:[%s3666_s1 + $0x5e0] sm:$0xff]  ;;  %v2049_v62 = vpack.c.bf16 %v616_v55, %v614_v54  ;;  %v615_v63 = vld [vmem:[%s3666_s1 + $0x5f0] sm:$0xff]  ;;  %v490_v0 = vld [vmem:[%s3666_s1 + $0x208] sm:$0xff]  ;;  %v1923_v4 = vpack.c.bf16 %v487_v60, %v485_v59 }
  0x5d   : > { %v492_v1 = vld [vmem:[%s3666_s1 + $0x218] sm:$0xff]  ;;  %v618_v2 = vld [vmem:[%s3666_s1 + $0x608] sm:$0xff]  ;;  %v2051_v5 = vpack.c.bf16 %v615_v63, %v613_v61  ;;  %v489_v7 = vld [vmem:[%s3666_s1 + $0x200] sm:$0xff] }
  0x5e   : > { %1904 = vmatpush1.bf16.msra.mxu1 %v1903_v6  ;;  %v620_v3 = vld [vmem:[%s3666_s1 + $0x618] sm:$0xff]  ;;  %v1925_v6 = vpack.c.bf16 %v492_v1, %v490_v0  ;;  %v617_v10 = vld [vmem:[%s3666_s1 + $0x600] sm:$0xff]  ;;  %v619_v11 = vld [vmem:[%s3666_s1 + $0x610] sm:$0xff] }
  0x5f   : > { %2032 = vmatpush1.bf16.msra.mxu0 %v2031_v8  ;;  %1906 = vmatprep.subr.bf16.mxu1 %v1905_v9  ;;  %v491_v8 = vld [vmem:[%s3666_s1 + $0x210] sm:$0xff]  ;;  %v2053_v9 = vpack.c.bf16 %v620_v3, %v618_v2  ;;  %v494_v12 = vld [vmem:[%s3666_s1 + $0x228] sm:$0xff]  ;;  %v169_v14 = vld [vmem:[%s2519_s23] sm:$0xff]  ;;  %v2055_v19 = vpack.c.bf16 %v619_v11, %v617_v10 }
  0x60   : > { %2034 = vmatprep.subr.bf16.mxu0 %v2033_v13  ;;  %v496_v13 = vld [vmem:[%s3666_s1 + $0x238] sm:$0xff]  ;;  %v1927_v15 = vpack.c.bf16 %v491_v8, %v489_v7  ;;  %v622_v16 = vld [vmem:[%s3666_s1 + $0x628] sm:$0xff]  ;;  %v173_v18 = vld [vmem:[%s2519_s23 + $0x20] sm:$0xff] }
  0x61   : > { %v624_v17 = vld [vmem:[%s3666_s1 + $0x638] sm:$0xff]  ;;  %v493_v23 = vld [vmem:[%s3666_s1 + $0x220] sm:$0xff]  ;;  %v495_v24 = vld [vmem:[%s3666_s1 + $0x230] sm:$0xff] }
  0x62   : > { %1908 = vmatpush1.bf16.msra.mxu1 %v1907_v20  ;;  %v178_v20 = vld [vmem:[%s2519_s23 + $0x48] sm:$0xff]  ;;  %v621_v25 = vld [vmem:[%s3666_s1 + $0x620] sm:$0xff]  ;;  %v623_v27 = vld [vmem:[%s3666_s1 + $0x630] sm:$0xff]  ;;  %v1931_v36 = vpack.c.bf16 %v495_v24, %v493_v23 }
  0x63   : > { %2036 = vmatpush1.bf16.msra.mxu0 %v2035_v21  ;;  %1910 = vmatprep.subr.bf16.mxu1 %v1909_v22  ;;  %v182_v21 = vld [vmem:[%s2519_s23 + $0x68] sm:$0xff]  ;;  %v1929_v22 = vpack.c.bf16 %v496_v13, %v494_v12  ;;  %v500_v29 = vld [vmem:[%s3666_s1 + $0x258] sm:$0xff]  ;;  %v177_v30 = vld [vmem:[%s2519_s23 + $0x40] sm:$0xff]  ;;  %v2059_v37 = vpack.c.bf16 %v623_v27, %v621_v25 }
  0x64   : > { %2038 = vmatprep.subr.bf16.mxu0 %v2037_v26  ;;  %v2057_v26 = vpack.c.bf16 %v624_v17, %v622_v16  ;;  %v498_v28 = vld [vmem:[%s3666_s1 + $0x248] sm:$0xff]  ;;  %v497_v39 = vld [vmem:[%s3666_s1 + $0x240] sm:$0xff]  ;;  %v499_v40 = vld [vmem:[%s3666_s1 + $0x250] sm:$0xff] }
  0x65   : > { %v626_v31 = vld [vmem:[%s3666_s1 + $0x648] sm:$0xff]  ;;  %v625_v41 = vld [vmem:[%s3666_s1 + $0x640] sm:$0xff]  ;;  %v627_v43 = vld [vmem:[%s3666_s1 + $0x650] sm:$0xff]  ;;  %v1935_v52 = vpack.c.bf16 %v499_v40, %v497_v39 }
  0x66   : > { %1912 = vmatpush1.bf16.msra.mxu1 %v1911_v32  ;;  %v628_v32 = vld [vmem:[%s3666_s1 + $0x658] sm:$0xff]  ;;  %v190_v35 = vld [vmem:[%s2519_s23 + $0xa8] sm:$0xff]  ;;  %v189_v49 = vld [vmem:[%s2519_s23 + $0xa0] sm:$0xff]  ;;  %v2063_v53 = vpack.c.bf16 %v627_v43, %v625_v41 }
  0x67   : > { %2040 = vmatpush1.bf16.msra.mxu0 %v2039_v33  ;;  %1914 = vmatprep.subr.bf16.mxu1 %v1913_v34  ;;  %v181_v33 = vld [vmem:[%s2519_s23 + $0x60] sm:$0xff]  ;;  %v186_v34 = vld [vmem:[%s2519_s23 + $0x88] sm:$0xff]  ;;  %v2061_v42 = vpack.c.bf16 %v628_v32, %v626_v31  ;;  %v632_v48 = vld [vmem:[%s3666_s1 + $0x678] sm:$0xff] }
  0x68   : > { %2042 = vmatprep.subr.bf16.mxu0 %v2041_v38  ;;  %v1933_v38 = vpack.c.bf16 %v500_v29, %v498_v28  ;;  %v630_v47 = vld [vmem:[%s3666_s1 + $0x668] sm:$0xff]  ;;  %v501_v55 = vld [vmem:[%s3666_s1 + $0x260] sm:$0xff]  ;;  %v631_v59 = vld [vmem:[%s3666_s1 + $0x670] sm:$0xff] }
  0x69   : > { %v198_v51 = vld [vmem:[%s2519_s23 + $0xe8] sm:$0xff]  ;;  %v508_v61 = vld [vmem:[%s3666_s1 + $0x298] sm:$0xff]  ;;  %v197_v1 = vld [vmem:[%s2519_s23 + $0xe0] sm:$0xff] }
  0x6a   : > { %1916 = vmatpush1.bf16.msra.mxu1 %v1915_v44  ;;  %v502_v44 = vld [vmem:[%s3666_s1 + $0x268] sm:$0xff]  ;;  %v636_v0 = vld [vmem:[%s3666_s1 + $0x698] sm:$0xff]  ;;  %v505_v7 = vld [vmem:[%s3666_s1 + $0x280] sm:$0xff] }
  0x6b   : > { %2044 = vmatpush1.bf16.msra.mxu0 %v2043_v45  ;;  %1918 = vmatprep.subr.bf16.mxu1 %v1917_v46  ;;  %v504_v45 = vld [vmem:[%s3666_s1 + $0x278] sm:$0xff]  ;;  %v185_v46 = vld [vmem:[%s2519_s23 + $0x80] sm:$0xff]  ;;  %v506_v60 = vld [vmem:[%s3666_s1 + $0x288] sm:$0xff] }
  0x6c   : > { %2046 = vmatprep.subr.bf16.mxu0 %v2045_v50  ;;  %v194_v50 = vld [vmem:[%s2519_s23 + $0xc8] sm:$0xff]  ;;  %v1937_v54 = vpack.c.bf16 %v504_v45, %v502_v44  ;;  %v507_v8 = vld [vmem:[%s3666_s1 + $0x290] sm:$0xff]  ;;  %v512_v13 = vld [vmem:[%s3666_s1 + $0x2b8] sm:$0xff] }
  0x6d   : > { %v634_v63 = vld [vmem:[%s3666_s1 + $0x688] sm:$0xff]  ;;  %v635_v11 = vld [vmem:[%s3666_s1 + $0x690] sm:$0xff]  ;;  %v640_v16 = vld [vmem:[%s3666_s1 + $0x6b8] sm:$0xff] }
  0x6e   : > { %1920 = vmatpush1.bf16.msra.mxu1 %v1919_v56  ;;  %v503_v56 = vld [vmem:[%s3666_s1 + $0x270] sm:$0xff]  ;;  %v202_v2 = vld [vmem:[%s2519_s23 + $0x108] sm:$0xff]  ;;  %v2069_v10 = vpack.c.bf16 %v636_v0, %v634_v63  ;;  %v205_v17 = vld [vmem:[%s2519_s23 + $0x120] sm:$0xff] }
  0x6f   : > { %2048 = vmatpush1.bf16.msra.mxu0 %v2047_v57  ;;  %1922 = vmatprep.subr.bf16.mxu1 %v1921_v58  ;;  %v629_v57 = vld [vmem:[%s3666_s1 + $0x660] sm:$0xff]  ;;  %v2065_v58 = vpack.c.bf16 %v632_v48, %v630_v47  ;;  %v206_v3 = vld [vmem:[%s2519_s23 + $0x128] sm:$0xff]  ;;  %v511_v24 = vld [vmem:[%s3666_s1 + $0x2b0] sm:$0xff] }
  0x70   : > { %2050 = vmatprep.subr.bf16.mxu0 %v2049_v62  ;;  %v193_v62 = vld [vmem:[%s2519_s23 + $0xc0] sm:$0xff]  ;;  %v510_v12 = vld [vmem:[%s3666_s1 + $0x2a8] sm:$0xff]  ;;  %v639_v27 = vld [vmem:[%s3666_s1 + $0x6b0] sm:$0xff] }
  0x71   : > { %v509_v23 = vld [vmem:[%s3666_s1 + $0x2a0] sm:$0xff]  ;;  %v514_v28 = vld [vmem:[%s3666_s1 + $0x2c8] sm:$0xff]  ;;  %v516_v29 = vld [vmem:[%s3666_s1 + $0x2d8] sm:$0xff] }
  0x72   : > { %1924 = vmatpush1.bf16.msra.mxu1 %v1923_v4  ;;  %v1939_v4 = vpack.c.bf16 %v503_v56, %v501_v55  ;;  %v637_v25 = vld [vmem:[%s3666_s1 + $0x6a0] sm:$0xff]  ;;  %v642_v31 = vld [vmem:[%s3666_s1 + $0x6c8] sm:$0xff]  ;;  %v644_v32 = vld [vmem:[%s3666_s1 + $0x6d8] sm:$0xff] }
  0x73   : > { %2052 = vmatpush1.bf16.msra.mxu0 %v2051_v5  ;;  %1926 = vmatprep.subr.bf16.mxu1 %v1925_v6  ;;  %v2067_v5 = vpack.c.bf16 %v631_v59, %v629_v57  ;;  %v1941_v6 = vpack.c.bf16 %v508_v61, %v506_v60  ;;  %v513_v39 = vld [vmem:[%s3666_s1 + $0x2c0] sm:$0xff]  ;;  %v515_v40 = vld [vmem:[%s3666_s1 + $0x2d0] sm:$0xff]  ;;  %v518_v44 = vld [vmem:[%s3666_s1 + $0x2e8] sm:$0xff] }
  0x74   : > { %2054 = vmatprep.subr.bf16.mxu0 %v2053_v9  ;;  %v633_v9 = vld [vmem:[%s3666_s1 + $0x680] sm:$0xff]  ;;  %v643_v43 = vld [vmem:[%s3666_s1 + $0x6d0] sm:$0xff]  ;;  %v520_v45 = vld [vmem:[%s3666_s1 + $0x2f8] sm:$0xff] }
  0x75   : > { %746 = vmatmul.mubr.f32.vlgmr.msra.gmra.mrb[0].mxu1 %v169_v14  ;;  %v201_v14 = vld [vmem:[%s2519_s23 + $0x100] sm:$0xff]  ;;  %v646_v47 = vld [vmem:[%s3666_s1 + $0x6e8] sm:$0xff]  ;;  %v648_v48 = vld [vmem:[%s3666_s1 + $0x6f8] sm:$0xff] }
  0x76   : > { %1260 = vmatmul.mubr.f32.vlgmr.msra.gmra.mrb[0].mxu0 %v173_v18  ;;  %1928 = vmatpush1.bf16.msra.mxu1 %v1927_v15  ;;  %v638_v15 = vld [vmem:[%s3666_s1 + $0x6a8] sm:$0xff]  ;;  %v641_v41 = vld [vmem:[%s3666_s1 + $0x6c0] sm:$0xff]  ;;  %v519_v56 = vld [vmem:[%s3666_s1 + $0x2f0] sm:$0xff] }
  0x77   : > { %2056 = vmatpush1.bf16.msra.mxu0 %v2055_v19  ;;  %751 = vmatprep.mubr.f32.mxu1 %v178_v20  ;;  %v210_v18 = vld [vmem:[%s2519_s23 + $0x148] sm:$0xff]  ;;  %v1943_v20 = vpack.c.bf16 %v507_v8, %v505_v7  ;;  %v517_v55 = vld [vmem:[%s3666_s1 + $0x2e0] sm:$0xff]  ;;  %v647_v59 = vld [vmem:[%s3666_s1 + $0x6f0] sm:$0xff] }
  0x78   : > { %1265 = vmatprep.mubr.f32.mxu0 %v182_v21  ;;  %1930 = vmatprep.subr.bf16.mxu1 %v1929_v22  ;;  %v214_v19 = vld [vmem:[%s2519_s23 + $0x168] sm:$0xff]  ;;  %v2071_v21 = vpack.c.bf16 %v635_v11, %v633_v9  ;;  %v1945_v22 = vpack.c.bf16 %v512_v13, %v510_v12  ;;  %v645_v57 = vld [vmem:[%s3666_s1 + $0x6e0] sm:$0xff]  ;;  %v524_v61 = vld [vmem:[%s3666_s1 + $0x318] sm:$0xff] }
  0x79   : > { %752 = vmatmul.mubr.f32.gmra.mrb[2].mxu1 %v177_v30  ;;  %2058 = vmatprep.subr.bf16.mxu0 %v2057_v26  ;;  %v2073_v26 = vpack.c.bf16 %v640_v16, %v638_v15  ;;  %v209_v30 = vld [vmem:[%s2519_s23 + $0x140] sm:$0xff]  ;;  %v522_v60 = vld [vmem:[%s3666_s1 + $0x308] sm:$0xff]  ;;  %v652_v0 = vld [vmem:[%s3666_s1 + $0x718] sm:$0xff] }
  0x7a   : > { %1266 = vmatmul.mubr.f32.gmra.mrb[2].mxu0 %v181_v33  ;;  %757 = vmatprep.mubr.f32.mxu1 %v186_v34  ;;  %v213_v33 = vld [vmem:[%s2519_s23 + $0x160] sm:$0xff]  ;;  %v218_v34 = vld [vmem:[%s2519_s23 + $0x188] sm:$0xff]  ;;  %v523_v8 = vld [vmem:[%s3666_s1 + $0x310] sm:$0xff] }
  0x7b   : > { %1271 = vmatprep.mubr.f32.mxu0 %v190_v35  ;;  %1932 = vmatpush1.bf16.msra.mxu1 %v1931_v36  ;;  %v222_v35 = vld [vmem:[%s2519_s23 + $0x1a8] sm:$0xff]  ;;  %v1947_v36 = vpack.c.bf16 %v511_v24, %v509_v23  ;;  %v521_v7 = vld [vmem:[%s3666_s1 + $0x300] sm:$0xff]  ;;  %v651_v11 = vld [vmem:[%s3666_s1 + $0x710] sm:$0xff] }
  0x7c   : > { %2060 = vmatpush1.bf16.msra.mxu0 %v2059_v37  ;;  %1934 = vmatprep.subr.bf16.mxu1 %v1933_v38  ;;  %v2075_v37 = vpack.c.bf16 %v639_v27, %v637_v25  ;;  %v1949_v38 = vpack.c.bf16 %v516_v29, %v514_v28  ;;  %v650_v63 = vld [vmem:[%s3666_s1 + $0x708] sm:$0xff]  ;;  %v649_v9 = vld [vmem:[%s3666_s1 + $0x700] sm:$0xff]  ;;  %v528_v13 = vld [vmem:[%s3666_s1 + $0x338] sm:$0xff] }
  0x7d   : > { %758 = vmatmul.mubr.f32.gmra.mrb[4].mxu1 %v185_v46  ;;  %2062 = vmatprep.subr.bf16.mxu0 %v2061_v42  ;;  %v2077_v42 = vpack.c.bf16 %v644_v32, %v642_v31  ;;  %v217_v46 = vld [vmem:[%s2519_s23 + $0x180] sm:$0xff]  ;;  %v526_v12 = vld [vmem:[%s3666_s1 + $0x328] sm:$0xff]  ;;  %v656_v16 = vld [vmem:[%s3666_s1 + $0x738] sm:$0xff] }
  0x7e   : > { %1272 = vmatmul.mubr.f32.gmra.mrb[4].mxu0 %v189_v49  ;;  %763 = vmatprep.mubr.f32.mxu1 %v194_v50  ;;  %v221_v49 = vld [vmem:[%s2519_s23 + $0x1a0] sm:$0xff]  ;;  %v226_v50 = vld [vmem:[%s2519_s23 + $0x1c8] sm:$0xff]  ;;  %v527_v24 = vld [vmem:[%s3666_s1 + $0x330] sm:$0xff] }
  0x7f   : > { %1277 = vmatprep.mubr.f32.mxu0 %v198_v51  ;;  %1936 = vmatpush1.bf16.msra.mxu1 %v1935_v52  ;;  %v230_v51 = vld [vmem:[%s2519_s23 + $0x1e8] sm:$0xff]  ;;  %v1951_v52 = vpack.c.bf16 %v515_v40, %v513_v39  ;;  %v525_v23 = vld [vmem:[%s3666_s1 + $0x320] sm:$0xff]  ;;  %v655_v27 = vld [vmem:[%s3666_s1 + $0x730] sm:$0xff] }
  0x80   : > { %2064 = vmatpush1.bf16.msra.mxu0 %v2063_v53  ;;  %1938 = vmatprep.subr.bf16.mxu1 %v1937_v54  ;;  %v2079_v53 = vpack.c.bf16 %v643_v43, %v641_v41  ;;  %v1953_v54 = vpack.c.bf16 %v520_v45, %v518_v44  ;;  %v654_v15 = vld [vmem:[%s3666_s1 + $0x728] sm:$0xff]  ;;  %v653_v25 = vld [vmem:[%s3666_s1 + $0x720] sm:$0xff]  ;;  %v532_v29 = vld [vmem:[%s3666_s1 + $0x358] sm:$0xff] }
  0x81   : > { %764 = vmatmul.mubr.f32.gmra.mrb[6].mxu1 %v193_v62  ;;  %2066 = vmatprep.subr.bf16.mxu0 %v2065_v58  ;;  %v2081_v58 = vpack.c.bf16 %v648_v48, %v646_v47  ;;  %v225_v62 = vld [vmem:[%s2519_s23 + $0x1c0] sm:$0xff]  ;;  %v530_v28 = vld [vmem:[%s3666_s1 + $0x348] sm:$0xff]  ;;  %v660_v32 = vld [vmem:[%s3666_s1 + $0x758] sm:$0xff] }
  0x82   : > { %1278 = vmatmul.mubr.f32.gmra.mrb[6].mxu0 %v197_v1  ;;  %769 = vmatprep.mubr.f32.mxu1 %v202_v2  ;;  %v229_v1 = vld [vmem:[%s2519_s23 + $0x1e0] sm:$0xff]  ;;  %v234_v2 = vld [vmem:[%s2519_s23 + $0x208] sm:$0xff]  ;;  %v531_v40 = vld [vmem:[%s3666_s1 + $0x350] sm:$0xff] }
  0x83   : > { %1283 = vmatprep.mubr.f32.mxu0 %v206_v3  ;;  %1940 = vmatpush1.bf16.msra.mxu1 %v1939_v4  ;;  %v238_v3 = vld [vmem:[%s2519_s23 + $0x228] sm:$0xff]  ;;  %v1955_v4 = vpack.c.bf16 %v519_v56, %v517_v55  ;;  %v529_v39 = vld [vmem:[%s3666_s1 + $0x340] sm:$0xff]  ;;  %v659_v43 = vld [vmem:[%s3666_s1 + $0x750] sm:$0xff] }
  0x84   : > { %2068 = vmatpush1.bf16.msra.mxu0 %v2067_v5  ;;  %1942 = vmatprep.subr.bf16.mxu1 %v1941_v6  ;;  %v2083_v5 = vpack.c.bf16 %v647_v59, %v645_v57  ;;  %v1957_v6 = vpack.c.bf16 %v524_v61, %v522_v60  ;;  %v658_v31 = vld [vmem:[%s3666_s1 + $0x748] sm:$0xff]  ;;  %v657_v41 = vld [vmem:[%s3666_s1 + $0x740] sm:$0xff]  ;;  %v536_v45 = vld [vmem:[%s3666_s1 + $0x378] sm:$0xff] }
  0x85   : > { %770 = vmatmul.mubr.f32.gmra.mrb[8].mxu1 %v201_v14  ;;  %2070 = vmatprep.subr.bf16.mxu0 %v2069_v10  ;;  %v2085_v10 = vpack.c.bf16 %v652_v0, %v650_v63  ;;  %v233_v14 = vld [vmem:[%s2519_s23 + $0x200] sm:$0xff]  ;;  %v534_v44 = vld [vmem:[%s3666_s1 + $0x368] sm:$0xff]  ;;  %v664_v48 = vld [vmem:[%s3666_s1 + $0x778] sm:$0xff] }
  0x86   : > { %1284 = vmatmul.mubr.f32.gmra.mrb[8].mxu0 %v205_v17  ;;  %775 = vmatprep.mubr.f32.mxu1 %v210_v18  ;;  %v237_v17 = vld [vmem:[%s2519_s23 + $0x220] sm:$0xff]  ;;  %v242_v18 = vld [vmem:[%s2519_s23 + $0x248] sm:$0xff]  ;;  %v535_v56 = vld [vmem:[%s3666_s1 + $0x370] sm:$0xff] }
  0x87   : > { %1289 = vmatprep.mubr.f32.mxu0 %v214_v19  ;;  %1944 = vmatpush1.bf16.msra.mxu1 %v1943_v20  ;;  %v246_v19 = vld [vmem:[%s2519_s23 + $0x268] sm:$0xff]  ;;  %v1959_v20 = vpack.c.bf16 %v523_v8, %v521_v7  ;;  %v533_v55 = vld [vmem:[%s3666_s1 + $0x360] sm:$0xff]  ;;  %v663_v59 = vld [vmem:[%s3666_s1 + $0x770] sm:$0xff] }
  0x88   : > { %2072 = vmatpush1.bf16.msra.mxu0 %v2071_v21  ;;  %1946 = vmatprep.subr.bf16.mxu1 %v1945_v22  ;;  %v2087_v21 = vpack.c.bf16 %v651_v11, %v649_v9  ;;  %v1961_v22 = vpack.c.bf16 %v528_v13, %v526_v12  ;;  %v662_v47 = vld [vmem:[%s3666_s1 + $0x768] sm:$0xff]  ;;  %v257_v61 = vld [vmem:[%s2519_s23 + $0x2c0] sm:$0xff]  ;;  %v539_v8 = vld [vmem:[%s3666_s1 + $0x390] sm:$0xff] }
  0x89   : > { %776 = vmatmul.mubr.f32.gmra.mrb[10].mxu1 %v209_v30  ;;  %2074 = vmatprep.subr.bf16.mxu0 %v2073_v26  ;;  %v2089_v26 = vpack.c.bf16 %v656_v16, %v654_v15  ;;  %v241_v30 = vld [vmem:[%s2519_s23 + $0x240] sm:$0xff]  ;;  %v2097_v57 = vpack.c.bf16 %v664_v48, %v662_v47  ;;  %v538_v60 = vld [vmem:[%s3666_s1 + $0x388] sm:$0xff]  ;;  %v667_v11 = vld [vmem:[%s3666_s1 + $0x790] sm:$0xff] }
  0x8a   : > { %1290 = vmatmul.mubr.f32.gmra.mrb[10].mxu0 %v213_v33  ;;  %781 = vmatprep.mubr.f32.mxu1 %v218_v34  ;;  %v245_v33 = vld [vmem:[%s2519_s23 + $0x260] sm:$0xff]  ;;  %v250_v34 = vld [vmem:[%s2519_s23 + $0x288] sm:$0xff]  ;;  %v675_v47 = vld [vmem:[%s3666_s1 + $0x7d0] sm:$0xff] }
  0x8b   : > { %1295 = vmatprep.mubr.f32.mxu0 %v222_v35  ;;  %1948 = vmatpush1.bf16.msra.mxu1 %v1947_v36  ;;  %v254_v35 = vld [vmem:[%s2519_s23 + $0x2a8] sm:$0xff]  ;;  %v1963_v36 = vpack.c.bf16 %v527_v24, %v525_v23  ;;  %v261_v0 = vld [vmem:[%s2519_s23 + $0x2e0] sm:$0xff] }
  0x8c   : > { %2076 = vmatpush1.bf16.msra.mxu0 %v2075_v37  ;;  %1950 = vmatprep.subr.bf16.mxu1 %v1949_v38  ;;  %v2091_v37 = vpack.c.bf16 %v655_v27, %v653_v25  ;;  %v1965_v38 = vpack.c.bf16 %v532_v29, %v530_v28  ;;  %v666_v63 = vld [vmem:[%s3666_s1 + $0x788] sm:$0xff]  ;;  %v537_v7 = vld [vmem:[%s3666_s1 + $0x380] sm:$0xff]  ;;  %v543_v25 = vld [vmem:[%s3666_s1 + $0x3b0] sm:$0xff] }
  0x8d   : > { %782 = vmatmul.mubr.f32.gmra.mrb[12].mxu1 %v217_v46  ;;  %2078 = vmatprep.subr.bf16.mxu0 %v2077_v42  ;;  %v2093_v42 = vpack.c.bf16 %v660_v32, %v658_v31  ;;  %v249_v46 = vld [vmem:[%s2519_s23 + $0x280] sm:$0xff]  ;;  %v278_v15 = vld [vmem:[%s2519_s23 + $0x368] sm:$0xff]  ;;  %v1975_v16 = vpack.c.bf16 %v539_v8, %v537_v7  ;;  %v671_v27 = vld [vmem:[%s3666_s1 + $0x7b0] sm:$0xff] }
  0x8e   : > { %1296 = vmatmul.mubr.f32.gmra.mrb[12].mxu0 %v221_v49  ;;  %787 = vmatprep.mubr.f32.mxu1 %v226_v50  ;;  %v253_v49 = vld [vmem:[%s2519_s23 + $0x2a0] sm:$0xff]  ;;  %v258_v50 = vld [vmem:[%s2519_s23 + $0x2c8] sm:$0xff] }
  0x8f   : > { %1301 = vmatprep.mubr.f32.mxu0 %v230_v51  ;;  %1952 = vmatpush1.bf16.msra.mxu1 %v1951_v52  ;;  %v1967_v51 = vpack.c.bf16 %v531_v40, %v529_v39  ;;  %v262_v52 = vld [vmem:[%s2519_s23 + $0x2e8] sm:$0xff]  ;;  %v265_v12 = vld [vmem:[%s2519_s23 + $0x300] sm:$0xff]  ;;  %v676_v39 = vld [vmem:[%s3666_s1 + $0x7d8] sm:$0xff] }
  0x90   : > { %2080 = vmatpush1.bf16.msra.mxu0 %v2079_v53  ;;  %1954 = vmatprep.subr.bf16.mxu1 %v1953_v54  ;;  %v2095_v53 = vpack.c.bf16 %v659_v43, %v657_v41  ;;  %v1969_v54 = vpack.c.bf16 %v536_v45, %v534_v44  ;;  %v269_v13 = vld [vmem:[%s2519_s23 + $0x320] sm:$0xff]  ;;  %v286_v32 = vld [vmem:[%s2519_s23 + $0x3a8] sm:$0xff] }
  0x91   : > { %788 = vmatmul.mubr.f32.gmra.mrb[14].mxu1 %v225_v62  ;;  %2082 = vmatprep.subr.bf16.mxu0 %v2081_v58  ;;  %v661_v58 = vld [vmem:[%s3666_s1 + $0x760] sm:$0xff]  ;;  %v540_v62 = vld [vmem:[%s3666_s1 + $0x398] sm:$0xff]  ;;  %v290_v45 = vld [vmem:[%s2519_s23 + $0x3c8] sm:$0xff] }
  0x92   : > { %1302 = vmatmul.mubr.f32.gmra.mrb[14].mxu0 %v229_v1  ;;  %793 = vmatprep.mubr.f32.mxu1 %v234_v2  ;;  %v266_v1 = vld [vmem:[%s2519_s23 + $0x308] sm:$0xff]  ;;  %v1971_v2 = vpack.c.bf16 %v535_v56, %v533_v55  ;;  %v541_v23 = vld [vmem:[%s3666_s1 + $0x3a0] sm:$0xff] }
  0x93   : > { %1307 = vmatprep.mubr.f32.mxu0 %v238_v3  ;;  %1956 = vmatpush1.bf16.msra.mxu1 %v1955_v4  ;;  %v668_v3 = vld [vmem:[%s3666_s1 + $0x798] sm:$0xff]  ;;  %v270_v4 = vld [vmem:[%s2519_s23 + $0x328] sm:$0xff]  ;;  %v273_v28 = vld [vmem:[%s2519_s23 + $0x340] sm:$0xff]  ;;  %v1979_v31 = vpack.c.bf16 %v543_v25, %v541_v23 }
  0x94   : > { %2084 = vmatpush1.bf16.msra.mxu0 %v2083_v5  ;;  %1958 = vmatprep.subr.bf16.mxu1 %v1957_v6  ;;  %v2099_v5 = vpack.c.bf16 %v663_v59, %v661_v58  ;;  %v1973_v6 = vpack.c.bf16 %v540_v62, %v538_v60  ;;  %v2101_v9 = vpack.c.bf16 %v668_v3, %v666_v63  ;;  %v277_v29 = vld [vmem:[%s2519_s23 + $0x360] sm:$0xff]  ;;  %v294_v48 = vld [vmem:[%s2519_s23 + $0x3e8] sm:$0xff]  ;;  %v551_v59 = vld [vmem:[%s3666_s1 + $0x3f0] sm:$0xff] }
  0x95   : > { %794 = vmatmul.mubr.f32.gmra.mrb[16].mxu1 %v233_v14  ;;  %2086 = vmatprep.subr.bf16.mxu0 %v2085_v10  ;;  %v665_v10 = vld [vmem:[%s3666_s1 + $0x780] sm:$0xff]  ;;  %v274_v14 = vld [vmem:[%s2519_s23 + $0x348] sm:$0xff] }
  0x96   : > { %1308 = vmatmul.mubr.f32.gmra.mrb[16].mxu0 %v237_v17  ;;  %799 = vmatprep.mubr.f32.mxu1 %v242_v18  ;;  %v542_v17 = vld [vmem:[%s3666_s1 + $0x3a8] sm:$0xff]  ;;  %v544_v18 = vld [vmem:[%s3666_s1 + $0x3b8] sm:$0xff]  ;;  %v545_v41 = vld [vmem:[%s3666_s1 + $0x3c0] sm:$0xff] }
  0x97   : > { %1313 = vmatprep.mubr.f32.mxu0 %v246_v19  ;;  %1960 = vmatpush1.bf16.msra.mxu1 %v1959_v20  ;;  %v2103_v19 = vpack.c.bf16 %v667_v11, %v665_v10  ;;  %v1977_v20 = vpack.c.bf16 %v544_v18, %v542_v17  ;;  %v673_v43 = vld [vmem:[%s3666_s1 + $0x7c0] sm:$0xff]  ;;  %v678_v55 = vld [vmem:[%s3666_s1 + $0x7e8] sm:$0xff] }
  0x98   : > { %2088 = vmatpush1.bf16.msra.mxu0 %v2087_v21  ;;  %1962 = vmatprep.subr.bf16.mxu1 %v1961_v22  ;;  %v670_v21 = vld [vmem:[%s3666_s1 + $0x7a8] sm:$0xff]  ;;  %v672_v22 = vld [vmem:[%s3666_s1 + $0x7b8] sm:$0xff]  ;;  %v285_v44 = vld [vmem:[%s2519_s23 + $0x3a0] sm:$0xff] }
  0x99   : > { %800 = vmatmul.mubr.f32.gmra.mrb[18].mxu1 %v241_v30  ;;  %2090 = vmatprep.subr.bf16.mxu0 %v2089_v26  ;;  %v2105_v24 = vpack.c.bf16 %v672_v22, %v670_v21  ;;  %v669_v26 = vld [vmem:[%s3666_s1 + $0x7a0] sm:$0xff]  ;;  %v282_v30 = vld [vmem:[%s2519_s23 + $0x388] sm:$0xff] }
  0x9a   : > { %1314 = vmatmul.mubr.f32.gmra.mrb[18].mxu0 %v245_v33  ;;  %805 = vmatprep.mubr.f32.mxu1 %v250_v34  ;;  %v2107_v33 = vpack.c.bf16 %v671_v27, %v669_v26  ;;  %v546_v34 = vld [vmem:[%s3666_s1 + $0x3c8] sm:$0xff]  ;;  %v549_v58 = vld [vmem:[%s3666_s1 + $0x3e0] sm:$0xff] }
  0x9b   : > { %1319 = vmatprep.mubr.f32.mxu0 %v254_v35  ;;  %1964 = vmatpush1.bf16.msra.mxu1 %v1963_v36  ;;  %v548_v35 = vld [vmem:[%s3666_s1 + $0x3d8] sm:$0xff]  ;;  %v281_v36 = vld [vmem:[%s2519_s23 + $0x380] sm:$0xff]  ;;  %v302_v60 = vld [vmem:[%s2519_s23 + $0x428] sm:$0xff]  ;;  %v1987_v62 = vpack.c.bf16 %v551_v59, %v549_v58 }
  0x9c   : > { %2092 = vmatpush1.bf16.msra.mxu0 %v2091_v37  ;;  %1966 = vmatprep.subr.bf16.mxu1 %v1965_v38  ;;  %v1981_v37 = vpack.c.bf16 %v548_v35, %v546_v34  ;;  %v674_v38 = vld [vmem:[%s3666_s1 + $0x7c8] sm:$0xff]  ;;  %v677_v63 = vld [vmem:[%s3666_s1 + $0x7e0] sm:$0xff] }
  0x9d   : > { %806 = vmatmul.mubr.f32.gmra.mrb[20].mxu1 %v249_v46  ;;  %2094 = vmatprep.subr.bf16.mxu0 %v2093_v42  ;;  %v2109_v40 = vpack.c.bf16 %v676_v39, %v674_v38  ;;  %v547_v42 = vld [vmem:[%s3666_s1 + $0x3d0] sm:$0xff]  ;;  %v301_v3 = vld [vmem:[%s2519_s23 + $0x420] sm:$0xff]  ;;  %v314_v8 = vld [vmem:[%s2519_s23 + $0x488] sm:$0xff] }
  0x9e   : > { %1320 = vmatmul.mubr.f32.gmra.mrb[20].mxu0 %v253_v49  ;;  %811 = vmatprep.mubr.f32.mxu1 %v258_v50  ;;  %v1983_v46 = vpack.c.bf16 %v547_v42, %v545_v41  ;;  %v2111_v49 = vpack.c.bf16 %v675_v47, %v673_v43  ;;  %v289_v50 = vld [vmem:[%s2519_s23 + $0x3c0] sm:$0xff]  ;;  %v334_v17 = vld [vmem:[%s2519_s23 + $0x528] sm:$0xff] }
  0x9f   : > { %1325 = vmatprep.mubr.f32.mxu0 %v262_v52  ;;  %1968 = vmatpush1.bf16.msra.mxu1 %v1967_v51  ;;  %v293_v51 = vld [vmem:[%s2519_s23 + $0x3e0] sm:$0xff]  ;;  %v550_v52 = vld [vmem:[%s3666_s1 + $0x3e8] sm:$0xff] }
  0xa0   : > { %2096 = vmatpush1.bf16.msra.mxu0 %v2095_v53  ;;  %1970 = vmatprep.subr.bf16.mxu1 %v1969_v54  ;;  %v298_v53 = vld [vmem:[%s2519_s23 + $0x408] sm:$0xff]  ;;  %v552_v54 = vld [vmem:[%s3666_s1 + $0x3f8] sm:$0xff]  ;;  %v309_v7 = vld [vmem:[%s2519_s23 + $0x460] sm:$0xff] }
  0xa1   : > { %812 = vmatmul.mubr.f32.gmra.mrb[22].mxu1 %v257_v61  ;;  %2098 = vmatprep.subr.bf16.mxu0 %v2097_v57  ;;  %v1985_v56 = vpack.c.bf16 %v552_v54, %v550_v52  ;;  %v680_v57 = vld [vmem:[%s3666_s1 + $0x7f8] sm:$0xff]  ;;  %v313_v10 = vld [vmem:[%s2519_s23 + $0x480] sm:$0xff]  ;;  %v342_v21 = vld [vmem:[%s2519_s23 + $0x568] sm:$0xff] }
  0xa2   : > { %1326 = vmatmul.mubr.f32.gmra.mrb[22].mxu0 %v261_v0  ;;  %817 = vmatprep.mubr.f32.mxu1 %v266_v1  ;;  %v2113_v61 = vpack.c.bf16 %v680_v57, %v678_v55  ;;  %v679_v0 = vld [vmem:[%s3666_s1 + $0x7f0] sm:$0xff]  ;;  %v317_v11 = vld [vmem:[%s2519_s23 + $0x4a0] sm:$0xff]  ;;  %v350_v25 = vld [vmem:[%s2519_s23 + $0x5a8] sm:$0xff] }
  0xa3   : > { %1331 = vmatprep.mubr.f32.mxu0 %v270_v4  ;;  %1972 = vmatpush1.bf16.msra.mxu1 %v1971_v2  ;;  %v2115_v1 = vpack.c.bf16 %v679_v0, %v677_v63  ;;  %v297_v2 = vld [vmem:[%s2519_s23 + $0x400] sm:$0xff]  ;;  %v306_v4 = vld [vmem:[%s2519_s23 + $0x448] sm:$0xff]  ;;  %v172_v0 = vld [vmem:[%s2519_s23 + $0x18] sm:$0xff] }
  0xa4   : > { %2100 = vmatpush1.bf16.msra.mxu0 %v2099_v5  ;;  %1974 = vmatprep.subr.bf16.mxu1 %v1973_v6  ;;  %v310_v5 = vld [vmem:[%s2519_s23 + $0x468] sm:$0xff]  ;;  %v305_v6 = vld [vmem:[%s2519_s23 + $0x440] sm:$0xff] }
  0xa5   : > { %818 = vmatmul.mubr.f32.gmra.mrb[24].mxu1 %v265_v12  ;;  %2102 = vmatprep.subr.bf16.mxu0 %v2101_v9  ;;  %v318_v9 = vld [vmem:[%s2519_s23 + $0x4a8] sm:$0xff]  ;;  %v329_v18 = vld [vmem:[%s2519_s23 + $0x500] sm:$0xff] }
  0xa6   : > { %1332 = vmatmul.mubr.f32.gmra.mrb[24].mxu0 %v269_v13  ;;  %823 = vmatprep.mubr.f32.mxu1 %v274_v14  ;;  %v322_v12 = vld [vmem:[%s2519_s23 + $0x4c8] sm:$0xff]  ;;  %v321_v14 = vld [vmem:[%s2519_s23 + $0x4c0] sm:$0xff] }
  0xa7   : > { %1337 = vmatprep.mubr.f32.mxu0 %v278_v15  ;;  %1976 = vmatpush1.bf16.msra.mxu1 %v1975_v16  ;;  %v326_v13 = vld [vmem:[%s2519_s23 + $0x4e8] sm:$0xff]  ;;  %v325_v15 = vld [vmem:[%s2519_s23 + $0x4e0] sm:$0xff] }
  0xa8   : > { %2104 = vmatpush1.bf16.msra.mxu0 %v2103_v19  ;;  %1978 = vmatprep.subr.bf16.mxu1 %v1977_v20  ;;  %v330_v16 = vld [vmem:[%s2519_s23 + $0x508] sm:$0xff]  ;;  %v333_v19 = vld [vmem:[%s2519_s23 + $0x520] sm:$0xff] }
  0xa9   : > { %824 = vmatmul.mubr.f32.gmra.mrb[26].mxu1 %v273_v28  ;;  %2106 = vmatprep.subr.bf16.mxu0 %v2105_v24  ;;  %v338_v20 = vld [vmem:[%s2519_s23 + $0x548] sm:$0xff]  ;;  %v337_v22 = vld [vmem:[%s2519_s23 + $0x540] sm:$0xff] }
  0xaa   : > { %1338 = vmatmul.mubr.f32.gmra.mrb[26].mxu0 %v277_v29  ;;  %829 = vmatprep.mubr.f32.mxu1 %v282_v30  ;;  %v341_v23 = vld [vmem:[%s2519_s23 + $0x560] sm:$0xff]  ;;  %v346_v24 = vld [vmem:[%s2519_s23 + $0x588] sm:$0xff] }
  0xab   : > { %1343 = vmatprep.mubr.f32.mxu0 %v286_v32  ;;  %1980 = vmatpush1.bf16.msra.mxu1 %v1979_v31  ;;  %v345_v26 = vld [vmem:[%s2519_s23 + $0x580] sm:$0xff]  ;;  %v354_v28 = vld [vmem:[%s2519_s23 + $0x5c8] sm:$0xff] }
  0xac   : > { %2108 = vmatpush1.bf16.msra.mxu0 %v2107_v33  ;;  %1982 = vmatprep.subr.bf16.mxu1 %v1981_v37  ;;  %v349_v27 = vld [vmem:[%s2519_s23 + $0x5a0] sm:$0xff]  ;;  %v358_v29 = vld [vmem:[%s2519_s23 + $0x5e8] sm:$0xff] }
  0xad   : > { %830 = vmatmul.mubr.f32.gmra.mrb[28].mxu1 %v281_v36  ;;  %2110 = vmatprep.subr.bf16.mxu0 %v2109_v40  ;;  %v353_v30 = vld [vmem:[%s2519_s23 + $0x5c0] sm:$0xff]  ;;  %v362_v32 = vld [vmem:[%s2519_s23 + $0x608] sm:$0xff] }
  0xae   : > { %1344 = vmatmul.mubr.f32.gmra.mrb[28].mxu0 %v285_v44  ;;  %835 = vmatprep.mubr.f32.mxu1 %v290_v45  ;;  %v357_v31 = vld [vmem:[%s2519_s23 + $0x5e0] sm:$0xff]  ;;  %v366_v33 = vld [vmem:[%s2519_s23 + $0x628] sm:$0xff] }
  0xaf   : > { %1349 = vmatprep.mubr.f32.mxu0 %v294_v48  ;;  %1984 = vmatpush1.bf16.msra.mxu1 %v1983_v46  ;;  %v361_v34 = vld [vmem:[%s2519_s23 + $0x600] sm:$0xff]  ;;  %v370_v36 = vld [vmem:[%s2519_s23 + $0x648] sm:$0xff] }
  0xb0   : > { %2112 = vmatpush1.bf16.msra.mxu0 %v2111_v49  ;;  %1986 = vmatprep.subr.bf16.mxu1 %v1985_v56  ;;  %v365_v35 = vld [vmem:[%s2519_s23 + $0x620] sm:$0xff]  ;;  %v374_v37 = vld [vmem:[%s2519_s23 + $0x668] sm:$0xff] }
  0xb1   : > { %836 = vmatmul.mubr.f32.gmra.mrb[30].mxu1 %v289_v50  ;;  %2114 = vmatprep.subr.bf16.mxu0 %v2113_v61  ;;  %v369_v38 = vld [vmem:[%s2519_s23 + $0x640] sm:$0xff]  ;;  %v378_v40 = vld [vmem:[%s2519_s23 + $0x688] sm:$0xff] }
  0xb2   : > { %1350 = vmatmul.mubr.f32.gmra.mrb[30].mxu0 %v293_v51  ;;  %841 = vmatprep.mubr.f32.mxu1 %v298_v53  ;;  %v373_v39 = vld [vmem:[%s2519_s23 + $0x660] sm:$0xff]  ;;  %v382_v41 = vld [vmem:[%s2519_s23 + $0x6a8] sm:$0xff] }
  0xb3   : > { %1355 = vmatprep.mubr.f32.mxu0 %v302_v60  ;;  %1988 = vmatpush1.bf16.msra.mxu1 %v1987_v62  ;;  %v377_v42 = vld [vmem:[%s2519_s23 + $0x680] sm:$0xff]  ;;  %v386_v44 = vld [vmem:[%s2519_s23 + $0x6c8] sm:$0xff] }
  0xb4   : > { %2116 = vmatpush1.bf16.msra.mxu0 %v2115_v1  ;;  %v381_v43 = vld [vmem:[%s2519_s23 + $0x6a0] sm:$0xff]  ;;  %v390_v45 = vld [vmem:[%s2519_s23 + $0x6e8] sm:$0xff]  ;;  %v176_v1 = vld [vmem:[%s2519_s23 + $0x38] sm:$0xff] }
  0xb5   : > { %842 = vmatmul.mubr.f32.gmra.mrb[32].mxu1 %v297_v2  ;;  %v385_v46 = vld [vmem:[%s2519_s23 + $0x6c0] sm:$0xff]  ;;  %v394_v48 = vld [vmem:[%s2519_s23 + $0x708] sm:$0xff]  ;;  %v171_v2 = vld [vmem:[%s2519_s23 + $0x10] sm:$0xff] }
  0xb6   : > { %1356 = vmatmul.mubr.f32.gmra.mrb[32].mxu0 %v301_v3  ;;  %847 = vmatprep.mubr.f32.mxu1 %v306_v4  ;;  %v389_v47 = vld [vmem:[%s2519_s23 + $0x6e0] sm:$0xff]  ;;  %v398_v49 = vld [vmem:[%s2519_s23 + $0x728] sm:$0xff]  ;;  %v175_v3 = vld [vmem:[%s2519_s23 + $0x30] sm:$0xff] }
  0xb7   : > { %1361 = vmatprep.mubr.f32.mxu0 %v310_v5  ;;  %v393_v50 = vld [vmem:[%s2519_s23 + $0x700] sm:$0xff]  ;;  %v402_v52 = vld [vmem:[%s2519_s23 + $0x748] sm:$0xff]  ;;  %v180_v4 = vld [vmem:[%s2519_s23 + $0x58] sm:$0xff] }
  0xb8   : > { %v397_v51 = vld [vmem:[%s2519_s23 + $0x720] sm:$0xff]  ;;  %v406_v53 = vld [vmem:[%s2519_s23 + $0x768] sm:$0xff]  ;;  %v184_v5 = vld [vmem:[%s2519_s23 + $0x78] sm:$0xff] }
  0xb9   : > { %848 = vmatmul.mubr.f32.gmra.mrb[34].mxu1 %v305_v6  ;;  %v401_v54 = vld [vmem:[%s2519_s23 + $0x740] sm:$0xff]  ;;  %v410_v56 = vld [vmem:[%s2519_s23 + $0x788] sm:$0xff]  ;;  %v179_v6 = vld [vmem:[%s2519_s23 + $0x50] sm:$0xff] }
  0xba   : > { %1362 = vmatmul.mubr.f32.gmra.mrb[34].mxu0 %v309_v7  ;;  %853 = vmatprep.mubr.f32.mxu1 %v314_v8  ;;  %v405_v55 = vld [vmem:[%s2519_s23 + $0x760] sm:$0xff]  ;;  %v414_v57 = vld [vmem:[%s2519_s23 + $0x7a8] sm:$0xff]  ;;  %v183_v7 = vld [vmem:[%s2519_s23 + $0x70] sm:$0xff] }
  0xbb   : > { %1367 = vmatprep.mubr.f32.mxu0 %v318_v9  ;;  %v409_v58 = vld [vmem:[%s2519_s23 + $0x780] sm:$0xff]  ;;  %v418_v60 = vld [vmem:[%s2519_s23 + $0x7c8] sm:$0xff]  ;;  %v188_v8 = vld [vmem:[%s2519_s23 + $0x98] sm:$0xff] }
  0xbc   : > { %v413_v59 = vld [vmem:[%s2519_s23 + $0x7a0] sm:$0xff]  ;;  %v422_v61 = vld [vmem:[%s2519_s23 + $0x7e8] sm:$0xff]  ;;  %v192_v9 = vld [vmem:[%s2519_s23 + $0xb8] sm:$0xff] }
  0xbd   : > { %854 = vmatmul.mubr.f32.gmra.mrb[36].mxu1 %v313_v10  ;;  %v417_v62 = vld [vmem:[%s2519_s23 + $0x7c0] sm:$0xff]  ;;  %v187_v10 = vld [vmem:[%s2519_s23 + $0x90] sm:$0xff] }
  0xbe   : > { %1368 = vmatmul.mubr.f32.gmra.mrb[36].mxu0 %v317_v11  ;;  %859 = vmatprep.mubr.f32.mxu1 %v322_v12  ;;  %v421_v63 = vld [vmem:[%s2519_s23 + $0x7e0] sm:$0xff]  ;;  %v191_v11 = vld [vmem:[%s2519_s23 + $0xb0] sm:$0xff]  ;;  %v196_v12 = vld [vmem:[%s2519_s23 + $0xd8] sm:$0xff] }
  0xbf   : > { %1373 = vmatprep.mubr.f32.mxu0 %v326_v13  ;;  %v200_v13 = vld [vmem:[%s2519_s23 + $0xf8] sm:$0xff] }
  0xc1   : > { %860 = vmatmul.mubr.f32.gmra.mrb[38].mxu1 %v321_v14  ;;  %v195_v14 = vld [vmem:[%s2519_s23 + $0xd0] sm:$0xff] }
  0xc2   : > { %1374 = vmatmul.mubr.f32.gmra.mrb[38].mxu0 %v325_v15  ;;  %865 = vmatprep.mubr.f32.mxu1 %v330_v16  ;;  %v199_v15 = vld [vmem:[%s2519_s23 + $0xf0] sm:$0xff]  ;;  %v204_v16 = vld [vmem:[%s2519_s23 + $0x118] sm:$0xff] }
  0xc3   : > { %1379 = vmatprep.mubr.f32.mxu0 %v334_v17  ;;  %v208_v17 = vld [vmem:[%s2519_s23 + $0x138] sm:$0xff] }
  0xc5   : > { %866 = vmatmul.mubr.f32.gmra.mrb[40].mxu1 %v329_v18  ;;  %v203_v18 = vld [vmem:[%s2519_s23 + $0x110] sm:$0xff] }
  0xc6   : > { %1380 = vmatmul.mubr.f32.gmra.mrb[40].mxu0 %v333_v19  ;;  %871 = vmatprep.mubr.f32.mxu1 %v338_v20  ;;  %v207_v19 = vld [vmem:[%s2519_s23 + $0x130] sm:$0xff]  ;;  %v212_v20 = vld [vmem:[%s2519_s23 + $0x158] sm:$0xff] }
  0xc7   : > { %1385 = vmatprep.mubr.f32.mxu0 %v342_v21  ;;  %v216_v21 = vld [vmem:[%s2519_s23 + $0x178] sm:$0xff] }
  0xc9   : > { %872 = vmatmul.mubr.f32.gmra.mrb[42].mxu1 %v337_v22  ;;  %v211_v22 = vld [vmem:[%s2519_s23 + $0x150] sm:$0xff] }
  0xca   : > { %1386 = vmatmul.mubr.f32.gmra.mrb[42].mxu0 %v341_v23  ;;  %877 = vmatprep.mubr.f32.mxu1 %v346_v24  ;;  %v215_v23 = vld [vmem:[%s2519_s23 + $0x170] sm:$0xff]  ;;  %v220_v24 = vld [vmem:[%s2519_s23 + $0x198] sm:$0xff] }
  0xcb   : > { %1391 = vmatprep.mubr.f32.mxu0 %v350_v25  ;;  %v224_v25 = vld [vmem:[%s2519_s23 + $0x1b8] sm:$0xff] }
  0xcd   : > { %878 = vmatmul.mubr.f32.gmra.mrb[44].mxu1 %v345_v26  ;;  %v219_v26 = vld [vmem:[%s2519_s23 + $0x190] sm:$0xff] }
  0xce   : > { %1392 = vmatmul.mubr.f32.gmra.mrb[44].mxu0 %v349_v27  ;;  %883 = vmatprep.mubr.f32.mxu1 %v354_v28  ;;  %v223_v27 = vld [vmem:[%s2519_s23 + $0x1b0] sm:$0xff]  ;;  %v228_v28 = vld [vmem:[%s2519_s23 + $0x1d8] sm:$0xff] }
  0xcf   : > { %1397 = vmatprep.mubr.f32.mxu0 %v358_v29  ;;  %v232_v29 = vld [vmem:[%s2519_s23 + $0x1f8] sm:$0xff] }
  0xd1   : > { %884 = vmatmul.mubr.f32.gmra.mrb[46].mxu1 %v353_v30  ;;  %v227_v30 = vld [vmem:[%s2519_s23 + $0x1d0] sm:$0xff] }
  0xd2   : > { %1398 = vmatmul.mubr.f32.gmra.mrb[46].mxu0 %v357_v31  ;;  %889 = vmatprep.mubr.f32.mxu1 %v362_v32  ;;  %v231_v31 = vld [vmem:[%s2519_s23 + $0x1f0] sm:$0xff]  ;;  %v236_v32 = vld [vmem:[%s2519_s23 + $0x218] sm:$0xff] }
  0xd3   : > { %1403 = vmatprep.mubr.f32.mxu0 %v366_v33  ;;  %v240_v33 = vld [vmem:[%s2519_s23 + $0x238] sm:$0xff] }
  0xd5   : > { %890 = vmatmul.mubr.f32.gmra.mrb[48].mxu1 %v361_v34  ;;  %v235_v34 = vld [vmem:[%s2519_s23 + $0x210] sm:$0xff] }
  0xd6   : > { %1404 = vmatmul.mubr.f32.gmra.mrb[48].mxu0 %v365_v35  ;;  %895 = vmatprep.mubr.f32.mxu1 %v370_v36  ;;  %v239_v35 = vld [vmem:[%s2519_s23 + $0x230] sm:$0xff]  ;;  %v244_v36 = vld [vmem:[%s2519_s23 + $0x258] sm:$0xff] }
  0xd7   : > { %1409 = vmatprep.mubr.f32.mxu0 %v374_v37  ;;  %v248_v37 = vld [vmem:[%s2519_s23 + $0x278] sm:$0xff] }
  0xd9   : > { %896 = vmatmul.mubr.f32.gmra.mrb[50].mxu1 %v369_v38  ;;  %v243_v38 = vld [vmem:[%s2519_s23 + $0x250] sm:$0xff] }
  0xda   : > { %1410 = vmatmul.mubr.f32.gmra.mrb[50].mxu0 %v373_v39  ;;  %901 = vmatprep.mubr.f32.mxu1 %v378_v40  ;;  %v247_v39 = vld [vmem:[%s2519_s23 + $0x270] sm:$0xff]  ;;  %v252_v40 = vld [vmem:[%s2519_s23 + $0x298] sm:$0xff] }
  0xdb   : > { %1415 = vmatprep.mubr.f32.mxu0 %v382_v41  ;;  %v256_v41 = vld [vmem:[%s2519_s23 + $0x2b8] sm:$0xff] }
  0xdd   : > { %902 = vmatmul.mubr.f32.gmra.mrb[52].mxu1 %v377_v42  ;;  %v251_v42 = vld [vmem:[%s2519_s23 + $0x290] sm:$0xff] }
  0xde   : > { %1416 = vmatmul.mubr.f32.gmra.mrb[52].mxu0 %v381_v43  ;;  %907 = vmatprep.mubr.f32.mxu1 %v386_v44  ;;  %v255_v43 = vld [vmem:[%s2519_s23 + $0x2b0] sm:$0xff]  ;;  %v260_v44 = vld [vmem:[%s2519_s23 + $0x2d8] sm:$0xff] }
  0xdf   : > { %1421 = vmatprep.mubr.f32.mxu0 %v390_v45  ;;  %v264_v45 = vld [vmem:[%s2519_s23 + $0x2f8] sm:$0xff] }
  0xe1   : > { %908 = vmatmul.mubr.f32.gmra.mrb[54].mxu1 %v385_v46  ;;  %v259_v46 = vld [vmem:[%s2519_s23 + $0x2d0] sm:$0xff] }
  0xe2   : > { %1422 = vmatmul.mubr.f32.gmra.mrb[54].mxu0 %v389_v47  ;;  %913 = vmatprep.mubr.f32.mxu1 %v394_v48  ;;  %v263_v47 = vld [vmem:[%s2519_s23 + $0x2f0] sm:$0xff]  ;;  %v268_v48 = vld [vmem:[%s2519_s23 + $0x318] sm:$0xff] }
  0xe3   : > { %1427 = vmatprep.mubr.f32.mxu0 %v398_v49  ;;  %v272_v49 = vld [vmem:[%s2519_s23 + $0x338] sm:$0xff] }
  0xe5   : > { %914 = vmatmul.mubr.f32.gmra.mrb[56].mxu1 %v393_v50  ;;  %v267_v50 = vld [vmem:[%s2519_s23 + $0x310] sm:$0xff] }
  0xe6   : > { %1428 = vmatmul.mubr.f32.gmra.mrb[56].mxu0 %v397_v51  ;;  %919 = vmatprep.mubr.f32.mxu1 %v402_v52  ;;  %v271_v51 = vld [vmem:[%s2519_s23 + $0x330] sm:$0xff]  ;;  %v276_v52 = vld [vmem:[%s2519_s23 + $0x358] sm:$0xff] }
  0xe7   : > { %1433 = vmatprep.mubr.f32.mxu0 %v406_v53  ;;  %v280_v53 = vld [vmem:[%s2519_s23 + $0x378] sm:$0xff] }
  0xe9   : > { %920 = vmatmul.mubr.f32.gmra.mrb[58].mxu1 %v401_v54  ;;  %v275_v54 = vld [vmem:[%s2519_s23 + $0x350] sm:$0xff] }
  0xea   : > { %1434 = vmatmul.mubr.f32.gmra.mrb[58].mxu0 %v405_v55  ;;  %925 = vmatprep.mubr.f32.mxu1 %v410_v56  ;;  %v279_v55 = vld [vmem:[%s2519_s23 + $0x370] sm:$0xff]  ;;  %v284_v56 = vld [vmem:[%s2519_s23 + $0x398] sm:$0xff] }
  0xeb   : > { %1439 = vmatprep.mubr.f32.mxu0 %v414_v57  ;;  %v288_v57 = vld [vmem:[%s2519_s23 + $0x3b8] sm:$0xff] }
  0xed   : > { %926 = vmatmul.mubr.f32.gmra.mrb[60].mxu1 %v409_v58  ;;  %v283_v58 = vld [vmem:[%s2519_s23 + $0x390] sm:$0xff] }
  0xee   : > { %1440 = vmatmul.mubr.f32.gmra.mrb[60].mxu0 %v413_v59  ;;  %931 = vmatprep.mubr.f32.mxu1 %v418_v60  ;;  %v287_v59 = vld [vmem:[%s2519_s23 + $0x3b0] sm:$0xff]  ;;  %v292_v60 = vld [vmem:[%s2519_s23 + $0x3d8] sm:$0xff] }
  0xef   : > { %1445 = vmatprep.mubr.f32.mxu0 %v422_v61  ;;  %v296_v61 = vld [vmem:[%s2519_s23 + $0x3f8] sm:$0xff] }
  0xf1   : > { %932 = vmatmul.mubr.f32.gmra.mrb[62].mxu1 %v417_v62  ;;  %v291_v62 = vld [vmem:[%s2519_s23 + $0x3d0] sm:$0xff] }
  0xf2   : > { %1446 = vmatmul.mubr.f32.gmra.mrb[62].mxu0 %v421_v63  ;;  %1002 = vmatprep.mubr.f32.mxu1 %v172_v0  ;;  %v295_v63 = vld [vmem:[%s2519_s23 + $0x3f0] sm:$0xff]  ;;  %v300_v0 = vld [vmem:[%s2519_s23 + $0x418] sm:$0xff] }
  0xf3   : > { %1516 = vmatprep.mubr.f32.mxu0 %v176_v1  ;;  %v304_v1 = vld [vmem:[%s2519_s23 + $0x438] sm:$0xff] }
  0xf5   : > { %1003 = vmatmul.mubr.f32.vlgmr.msra.gmra.mrb[0].mxu1 %v171_v2  ;;  %v299_v2 = vld [vmem:[%s2519_s23 + $0x410] sm:$0xff] }
  0xf6   : > { %1517 = vmatmul.mubr.f32.vlgmr.msra.gmra.mrb[0].mxu0 %v175_v3  ;;  %1008 = vmatprep.mubr.f32.mxu1 %v180_v4  ;;  %v303_v3 = vld [vmem:[%s2519_s23 + $0x430] sm:$0xff]  ;;  %v308_v4 = vld [vmem:[%s2519_s23 + $0x458] sm:$0xff] }
  0xf7   : > { %1522 = vmatprep.mubr.f32.mxu0 %v184_v5  ;;  %v312_v5 = vld [vmem:[%s2519_s23 + $0x478] sm:$0xff] }
  0xf9   : > { %1009 = vmatmul.mubr.f32.gmra.mrb[2].mxu1 %v179_v6  ;;  %v307_v6 = vld [vmem:[%s2519_s23 + $0x450] sm:$0xff] }
  0xfa   : > { %1523 = vmatmul.mubr.f32.gmra.mrb[2].mxu0 %v183_v7  ;;  %1014 = vmatprep.mubr.f32.mxu1 %v188_v8  ;;  %v311_v7 = vld [vmem:[%s2519_s23 + $0x470] sm:$0xff]  ;;  %v316_v8 = vld [vmem:[%s2519_s23 + $0x498] sm:$0xff] }
  0xfb   : > { %1528 = vmatprep.mubr.f32.mxu0 %v192_v9  ;;  %v320_v9 = vld [vmem:[%s2519_s23 + $0x4b8] sm:$0xff] }
  0xfd   : > { %1015 = vmatmul.mubr.f32.gmra.mrb[4].mxu1 %v187_v10  ;;  %v315_v10 = vld [vmem:[%s2519_s23 + $0x490] sm:$0xff] }
  0xfe   : > { %1529 = vmatmul.mubr.f32.gmra.mrb[4].mxu0 %v191_v11  ;;  %1020 = vmatprep.mubr.f32.mxu1 %v196_v12  ;;  %v319_v11 = vld [vmem:[%s2519_s23 + $0x4b0] sm:$0xff]  ;;  %v324_v12 = vld [vmem:[%s2519_s23 + $0x4d8] sm:$0xff] }
  0xff   : > { %1534 = vmatprep.mubr.f32.mxu0 %v200_v13  ;;  %v328_v13 = vld [vmem:[%s2519_s23 + $0x4f8] sm:$0xff] }
 0x101   : > { %1021 = vmatmul.mubr.f32.gmra.mrb[6].mxu1 %v195_v14  ;;  %v323_v14 = vld [vmem:[%s2519_s23 + $0x4d0] sm:$0xff] }
 0x102   : > { %1535 = vmatmul.mubr.f32.gmra.mrb[6].mxu0 %v199_v15  ;;  %1026 = vmatprep.mubr.f32.mxu1 %v204_v16  ;;  %v327_v15 = vld [vmem:[%s2519_s23 + $0x4f0] sm:$0xff]  ;;  %v332_v16 = vld [vmem:[%s2519_s23 + $0x518] sm:$0xff] }
 0x103   : > { %1540 = vmatprep.mubr.f32.mxu0 %v208_v17  ;;  %v336_v17 = vld [vmem:[%s2519_s23 + $0x538] sm:$0xff] }
 0x105   : > { %1027 = vmatmul.mubr.f32.gmra.mrb[8].mxu1 %v203_v18  ;;  %v331_v18 = vld [vmem:[%s2519_s23 + $0x510] sm:$0xff] }
 0x106   : > { %1541 = vmatmul.mubr.f32.gmra.mrb[8].mxu0 %v207_v19  ;;  %1032 = vmatprep.mubr.f32.mxu1 %v212_v20  ;;  %v335_v19 = vld [vmem:[%s2519_s23 + $0x530] sm:$0xff]  ;;  %v340_v20 = vld [vmem:[%s2519_s23 + $0x558] sm:$0xff] }
 0x107   : > { %1546 = vmatprep.mubr.f32.mxu0 %v216_v21  ;;  %v344_v21 = vld [vmem:[%s2519_s23 + $0x578] sm:$0xff] }
 0x109   : > { %1033 = vmatmul.mubr.f32.gmra.mrb[10].mxu1 %v211_v22  ;;  %v339_v22 = vld [vmem:[%s2519_s23 + $0x550] sm:$0xff] }
 0x10a   : > { %1547 = vmatmul.mubr.f32.gmra.mrb[10].mxu0 %v215_v23  ;;  %1038 = vmatprep.mubr.f32.mxu1 %v220_v24  ;;  %v343_v23 = vld [vmem:[%s2519_s23 + $0x570] sm:$0xff]  ;;  %v348_v24 = vld [vmem:[%s2519_s23 + $0x598] sm:$0xff] }
 0x10b   : > { %1552 = vmatprep.mubr.f32.mxu0 %v224_v25  ;;  %v352_v25 = vld [vmem:[%s2519_s23 + $0x5b8] sm:$0xff] }
 0x10d   : > { %1039 = vmatmul.mubr.f32.gmra.mrb[12].mxu1 %v219_v26  ;;  %v347_v26 = vld [vmem:[%s2519_s23 + $0x590] sm:$0xff] }
 0x10e   : > { %1553 = vmatmul.mubr.f32.gmra.mrb[12].mxu0 %v223_v27  ;;  %1044 = vmatprep.mubr.f32.mxu1 %v228_v28  ;;  %v351_v27 = vld [vmem:[%s2519_s23 + $0x5b0] sm:$0xff]  ;;  %v356_v28 = vld [vmem:[%s2519_s23 + $0x5d8] sm:$0xff] }
 0x10f   : > { %1558 = vmatprep.mubr.f32.mxu0 %v232_v29  ;;  %v360_v29 = vld [vmem:[%s2519_s23 + $0x5f8] sm:$0xff] }
 0x111   : > { %1045 = vmatmul.mubr.f32.gmra.mrb[14].mxu1 %v227_v30  ;;  %v355_v30 = vld [vmem:[%s2519_s23 + $0x5d0] sm:$0xff] }
 0x112   : > { %1559 = vmatmul.mubr.f32.gmra.mrb[14].mxu0 %v231_v31  ;;  %1050 = vmatprep.mubr.f32.mxu1 %v236_v32  ;;  %v359_v31 = vld [vmem:[%s2519_s23 + $0x5f0] sm:$0xff]  ;;  %v364_v32 = vld [vmem:[%s2519_s23 + $0x618] sm:$0xff] }
 0x113   : > { %1564 = vmatprep.mubr.f32.mxu0 %v240_v33  ;;  %v368_v33 = vld [vmem:[%s2519_s23 + $0x638] sm:$0xff] }
 0x115   : > { %1051 = vmatmul.mubr.f32.gmra.mrb[16].mxu1 %v235_v34  ;;  %v363_v34 = vld [vmem:[%s2519_s23 + $0x610] sm:$0xff] }
 0x116   : > { %1565 = vmatmul.mubr.f32.gmra.mrb[16].mxu0 %v239_v35  ;;  %1056 = vmatprep.mubr.f32.mxu1 %v244_v36  ;;  %v367_v35 = vld [vmem:[%s2519_s23 + $0x630] sm:$0xff]  ;;  %v372_v36 = vld [vmem:[%s2519_s23 + $0x658] sm:$0xff] }
 0x117   : > { %1570 = vmatprep.mubr.f32.mxu0 %v248_v37  ;;  %v376_v37 = vld [vmem:[%s2519_s23 + $0x678] sm:$0xff] }
 0x119   : > { %1057 = vmatmul.mubr.f32.gmra.mrb[18].mxu1 %v243_v38  ;;  %v371_v38 = vld [vmem:[%s2519_s23 + $0x650] sm:$0xff] }
 0x11a   : > { %1571 = vmatmul.mubr.f32.gmra.mrb[18].mxu0 %v247_v39  ;;  %1062 = vmatprep.mubr.f32.mxu1 %v252_v40  ;;  %v375_v39 = vld [vmem:[%s2519_s23 + $0x670] sm:$0xff]  ;;  %v380_v40 = vld [vmem:[%s2519_s23 + $0x698] sm:$0xff] }
 0x11b   : > { %1576 = vmatprep.mubr.f32.mxu0 %v256_v41  ;;  %v384_v41 = vld [vmem:[%s2519_s23 + $0x6b8] sm:$0xff] }
 0x11d   : > { %1063 = vmatmul.mubr.f32.gmra.mrb[20].mxu1 %v251_v42  ;;  %v379_v42 = vld [vmem:[%s2519_s23 + $0x690] sm:$0xff] }
 0x11e   : > { %1577 = vmatmul.mubr.f32.gmra.mrb[20].mxu0 %v255_v43  ;;  %1068 = vmatprep.mubr.f32.mxu1 %v260_v44  ;;  %v383_v43 = vld [vmem:[%s2519_s23 + $0x6b0] sm:$0xff]  ;;  %v388_v44 = vld [vmem:[%s2519_s23 + $0x6d8] sm:$0xff] }
 0x11f   : > { %1582 = vmatprep.mubr.f32.mxu0 %v264_v45  ;;  %v392_v45 = vld [vmem:[%s2519_s23 + $0x6f8] sm:$0xff] }
 0x121   : > { %1069 = vmatmul.mubr.f32.gmra.mrb[22].mxu1 %v259_v46  ;;  %v387_v46 = vld [vmem:[%s2519_s23 + $0x6d0] sm:$0xff] }
 0x122   : > { %1583 = vmatmul.mubr.f32.gmra.mrb[22].mxu0 %v263_v47  ;;  %1074 = vmatprep.mubr.f32.mxu1 %v268_v48  ;;  %v391_v47 = vld [vmem:[%s2519_s23 + $0x6f0] sm:$0xff]  ;;  %v396_v48 = vld [vmem:[%s2519_s23 + $0x718] sm:$0xff] }
 0x123   : > { %1588 = vmatprep.mubr.f32.mxu0 %v272_v49  ;;  %v400_v49 = vld [vmem:[%s2519_s23 + $0x738] sm:$0xff] }
 0x125   : > { %1075 = vmatmul.mubr.f32.gmra.mrb[24].mxu1 %v267_v50  ;;  %v395_v50 = vld [vmem:[%s2519_s23 + $0x710] sm:$0xff] }
 0x126   : > { %1589 = vmatmul.mubr.f32.gmra.mrb[24].mxu0 %v271_v51  ;;  %1080 = vmatprep.mubr.f32.mxu1 %v276_v52  ;;  %v399_v51 = vld [vmem:[%s2519_s23 + $0x730] sm:$0xff]  ;;  %v404_v52 = vld [vmem:[%s2519_s23 + $0x758] sm:$0xff] }
 0x127   : > { %1594 = vmatprep.mubr.f32.mxu0 %v280_v53  ;;  %v408_v53 = vld [vmem:[%s2519_s23 + $0x778] sm:$0xff] }
 0x129   : > { %1081 = vmatmul.mubr.f32.gmra.mrb[26].mxu1 %v275_v54  ;;  %v403_v54 = vld [vmem:[%s2519_s23 + $0x750] sm:$0xff] }
 0x12a   : > { %1595 = vmatmul.mubr.f32.gmra.mrb[26].mxu0 %v279_v55  ;;  %1086 = vmatprep.mubr.f32.mxu1 %v284_v56  ;;  %v407_v55 = vld [vmem:[%s2519_s23 + $0x770] sm:$0xff]  ;;  %v412_v56 = vld [vmem:[%s2519_s23 + $0x798] sm:$0xff] }
 0x12b   : > { %1600 = vmatprep.mubr.f32.mxu0 %v288_v57  ;;  %v416_v57 = vld [vmem:[%s2519_s23 + $0x7b8] sm:$0xff] }
 0x12d   : > { %1087 = vmatmul.mubr.f32.gmra.mrb[28].mxu1 %v283_v58  ;;  %v411_v58 = vld [vmem:[%s2519_s23 + $0x790] sm:$0xff] }
 0x12e   : > { %1601 = vmatmul.mubr.f32.gmra.mrb[28].mxu0 %v287_v59  ;;  %1092 = vmatprep.mubr.f32.mxu1 %v292_v60  ;;  %v415_v59 = vld [vmem:[%s2519_s23 + $0x7b0] sm:$0xff]  ;;  %v420_v60 = vld [vmem:[%s2519_s23 + $0x7d8] sm:$0xff] }
 0x12f   : > { %1606 = vmatprep.mubr.f32.mxu0 %v296_v61  ;;  %v424_v61 = vld [vmem:[%s2519_s23 + $0x7f8] sm:$0xff] }
 0x131   : > { %1093 = vmatmul.mubr.f32.gmra.mrb[30].mxu1 %v291_v62  ;;  %v419_v62 = vld [vmem:[%s2519_s23 + $0x7d0] sm:$0xff] }
 0x132   : > { %1607 = vmatmul.mubr.f32.gmra.mrb[30].mxu0 %v295_v63  ;;  %1098 = vmatprep.mubr.f32.mxu1 %v300_v0  ;;  %v423_v63 = vld [vmem:[%s2519_s23 + $0x7f0] sm:$0xff] }
 0x133   : > { %1612 = vmatprep.mubr.f32.mxu0 %v304_v1 }
 0x135   : > { %1099 = vmatmul.mubr.f32.gmra.mrb[32].mxu1 %v299_v2 }
 0x136   : > { %1613 = vmatmul.mubr.f32.gmra.mrb[32].mxu0 %v303_v3  ;;  %1104 = vmatprep.mubr.f32.mxu1 %v308_v4 }
 0x137   : > { %1618 = vmatprep.mubr.f32.mxu0 %v312_v5 }
 0x139   : > { %1105 = vmatmul.mubr.f32.gmra.mrb[34].mxu1 %v307_v6 }
 0x13a   : > { %1619 = vmatmul.mubr.f32.gmra.mrb[34].mxu0 %v311_v7  ;;  %1110 = vmatprep.mubr.f32.mxu1 %v316_v8 }
 0x13b   : > { %1624 = vmatprep.mubr.f32.mxu0 %v320_v9 }
 0x13d   : > { %1111 = vmatmul.mubr.f32.gmra.mrb[36].mxu1 %v315_v10 }
 0x13e   : > { %1625 = vmatmul.mubr.f32.gmra.mrb[36].mxu0 %v319_v11  ;;  %1116 = vmatprep.mubr.f32.mxu1 %v324_v12 }
 0x13f   : > { %1630 = vmatprep.mubr.f32.mxu0 %v328_v13 }
 0x141   : > { %1117 = vmatmul.mubr.f32.gmra.mrb[38].mxu1 %v323_v14 }
 0x142   : > { %1631 = vmatmul.mubr.f32.gmra.mrb[38].mxu0 %v327_v15  ;;  %1122 = vmatprep.mubr.f32.mxu1 %v332_v16 }
 0x143   : > { %1636 = vmatprep.mubr.f32.mxu0 %v336_v17 }
 0x145   : > { %1123 = vmatmul.mubr.f32.gmra.mrb[40].mxu1 %v331_v18 }
 0x146   : > { %1637 = vmatmul.mubr.f32.gmra.mrb[40].mxu0 %v335_v19  ;;  %1128 = vmatprep.mubr.f32.mxu1 %v340_v20 }
 0x147   : > { %1642 = vmatprep.mubr.f32.mxu0 %v344_v21 }
 0x149   : > { %1129 = vmatmul.mubr.f32.gmra.mrb[42].mxu1 %v339_v22 }
 0x14a   : > { %1643 = vmatmul.mubr.f32.gmra.mrb[42].mxu0 %v343_v23  ;;  %1134 = vmatprep.mubr.f32.mxu1 %v348_v24 }
 0x14b   : > { %1648 = vmatprep.mubr.f32.mxu0 %v352_v25 }
 0x14d   : > { %1135 = vmatmul.mubr.f32.gmra.mrb[44].mxu1 %v347_v26 }
 0x14e   : > { %1649 = vmatmul.mubr.f32.gmra.mrb[44].mxu0 %v351_v27  ;;  %1140 = vmatprep.mubr.f32.mxu1 %v356_v28 }
 0x14f   : > { %1654 = vmatprep.mubr.f32.mxu0 %v360_v29 }
 0x151   : > { %1141 = vmatmul.mubr.f32.gmra.mrb[46].mxu1 %v355_v30 }
 0x152   : > { %1655 = vmatmul.mubr.f32.gmra.mrb[46].mxu0 %v359_v31  ;;  %1146 = vmatprep.mubr.f32.mxu1 %v364_v32 }
 0x153   : > { %1660 = vmatprep.mubr.f32.mxu0 %v368_v33 }
 0x155   : > { %1147 = vmatmul.mubr.f32.gmra.mrb[48].mxu1 %v363_v34 }
 0x156   : > { %1661 = vmatmul.mubr.f32.gmra.mrb[48].mxu0 %v367_v35  ;;  %1152 = vmatprep.mubr.f32.mxu1 %v372_v36 }
 0x157   : > { %1666 = vmatprep.mubr.f32.mxu0 %v376_v37 }
 0x159   : > { %1153 = vmatmul.mubr.f32.gmra.mrb[50].mxu1 %v371_v38 }
 0x15a   : > { %1667 = vmatmul.mubr.f32.gmra.mrb[50].mxu0 %v375_v39  ;;  %1158 = vmatprep.mubr.f32.mxu1 %v380_v40 }
 0x15b   : > { %1672 = vmatprep.mubr.f32.mxu0 %v384_v41 }
 0x15d   : > { %1159 = vmatmul.mubr.f32.gmra.mrb[52].mxu1 %v379_v42 }
 0x15e   : > { %1673 = vmatmul.mubr.f32.gmra.mrb[52].mxu0 %v383_v43  ;;  %1164 = vmatprep.mubr.f32.mxu1 %v388_v44 }
 0x15f   : > { %1678 = vmatprep.mubr.f32.mxu0 %v392_v45 }
 0x161   : > { %1165 = vmatmul.mubr.f32.gmra.mrb[54].mxu1 %v387_v46 }
 0x162   : > { %1679 = vmatmul.mubr.f32.gmra.mrb[54].mxu0 %v391_v47  ;;  %1170 = vmatprep.mubr.f32.mxu1 %v396_v48 }
 0x163   : > { %1684 = vmatprep.mubr.f32.mxu0 %v400_v49 }
 0x165   : > { %1171 = vmatmul.mubr.f32.gmra.mrb[56].mxu1 %v395_v50 }
 0x166   : > { %1685 = vmatmul.mubr.f32.gmra.mrb[56].mxu0 %v399_v51  ;;  %1176 = vmatprep.mubr.f32.mxu1 %v404_v52 }
 0x167   : > { %1690 = vmatprep.mubr.f32.mxu0 %v408_v53 }
 0x169   : > { %1177 = vmatmul.mubr.f32.gmra.mrb[58].mxu1 %v403_v54 }
 0x16a   : > { %1691 = vmatmul.mubr.f32.gmra.mrb[58].mxu0 %v407_v55  ;;  %1182 = vmatprep.mubr.f32.mxu1 %v412_v56 }
 0x16b   : > { %1696 = vmatprep.mubr.f32.mxu0 %v416_v57 }
 0x16d   : > { %1183 = vmatmul.mubr.f32.gmra.mrb[60].mxu1 %v411_v58 }
 0x16e   : > { %1697 = vmatmul.mubr.f32.gmra.mrb[60].mxu0 %v415_v59  ;;  %1188 = vmatprep.mubr.f32.mxu1 %v420_v60 }
 0x16f   : > { %1702 = vmatprep.mubr.f32.mxu0 %v424_v61 }
 0x171   : > { %1189 = vmatmul.mubr.f32.gmra.mrb[62].mxu1 %v419_v62 }
 0x172   : > { %1703 = vmatmul.mubr.f32.gmra.mrb[62].mxu0 %v423_v63 }
 0x1c8   : > { %v1004_v0 = vpop.f32.mrb[0].mxu1 }
 0x1c9   : > { %v1518_v1 = vpop.f32.mrb[0].mxu0  ;;  %v1006_v2 = vpop.f32.mrb[1].mxu1 }
 0x1ca   : > { %v2117_v3 = vadd.f32 %v1518_v1, %v1004_v0  ;;  %v1520_v4 = vpop.f32.mrb[1].mxu0 }
 0x1cb   : > { %v2118_v5 = vadd.f32 %v1520_v4, %v1006_v2 }
 0x1cc   : > { %1709 = vst [vmem:[%s3554_s7] sm:$0xff] %v2117_v3  ;;  %v1010_v6 = vpop.f32.mrb[2].mxu1 }
 0x1cd   : > { %1711 = vst.msk [vmem:[%s3554_s7 + $0x8] sm:$0xff] %vm1710_vm0, %v2118_v5  ;;  %v1524_v7 = vpop.f32.mrb[2].mxu0  ;;  %v1012_v8 = vpop.f32.mrb[3].mxu1 }
 0x1ce   : > { %v2119_v9 = vadd.f32 %v1524_v7, %v1010_v6  ;;  %v1526_v10 = vpop.f32.mrb[3].mxu0 }
 0x1cf   : > { %v2120_v11 = vadd.f32 %v1526_v10, %v1012_v8 }
 0x1d0   : > { %1712 = vst [vmem:[%s3554_s7 + $0x10] sm:$0xff] %v2119_v9  ;;  %v1016_v12 = vpop.f32.mrb[4].mxu1 }
 0x1d1   : > { %1713 = vst.msk [vmem:[%s3554_s7 + $0x18] sm:$0xff] %vm1710_vm0, %v2120_v11  ;;  %v1530_v13 = vpop.f32.mrb[4].mxu0  ;;  %v1018_v14 = vpop.f32.mrb[5].mxu1 }
 0x1d2   : > { %v2121_v15 = vadd.f32 %v1530_v13, %v1016_v12  ;;  %v1532_v16 = vpop.f32.mrb[5].mxu0 }
 0x1d3   : > { %v2122_v17 = vadd.f32 %v1532_v16, %v1018_v14 }
 0x1d4   : > { %1714 = vst [vmem:[%s3554_s7 + $0x20] sm:$0xff] %v2121_v15  ;;  %v1022_v18 = vpop.f32.mrb[6].mxu1 }
 0x1d5   : > { %1715 = vst.msk [vmem:[%s3554_s7 + $0x28] sm:$0xff] %vm1710_vm0, %v2122_v17  ;;  %v1536_v19 = vpop.f32.mrb[6].mxu0  ;;  %v1024_v20 = vpop.f32.mrb[7].mxu1 }
 0x1d6   : > { %v2123_v21 = vadd.f32 %v1536_v19, %v1022_v18  ;;  %v1538_v22 = vpop.f32.mrb[7].mxu0 }
 0x1d7   : > { %v2124_v23 = vadd.f32 %v1538_v22, %v1024_v20 }
 0x1d8   : > { %1716 = vst [vmem:[%s3554_s7 + $0x30] sm:$0xff] %v2123_v21  ;;  %v1028_v24 = vpop.f32.mrb[8].mxu1 }
 0x1d9   : > { %1717 = vst.msk [vmem:[%s3554_s7 + $0x38] sm:$0xff] %vm1710_vm0, %v2124_v23  ;;  %v1542_v25 = vpop.f32.mrb[8].mxu0  ;;  %v1030_v26 = vpop.f32.mrb[9].mxu1 }
 0x1da   : > { %v2125_v27 = vadd.f32 %v1542_v25, %v1028_v24  ;;  %v1544_v28 = vpop.f32.mrb[9].mxu0 }
 0x1db   : > { %v2126_v29 = vadd.f32 %v1544_v28, %v1030_v26 }
 0x1dc   : > { %1718 = vst [vmem:[%s3554_s7 + $0x40] sm:$0xff] %v2125_v27  ;;  %v1034_v30 = vpop.f32.mrb[10].mxu1 }
 0x1dd   : > { %1719 = vst.msk [vmem:[%s3554_s7 + $0x48] sm:$0xff] %vm1710_vm0, %v2126_v29  ;;  %v1548_v31 = vpop.f32.mrb[10].mxu0  ;;  %v1036_v32 = vpop.f32.mrb[11].mxu1 }
 0x1de   : > { %v2127_v33 = vadd.f32 %v1548_v31, %v1034_v30  ;;  %v1550_v34 = vpop.f32.mrb[11].mxu0 }
 0x1df   : > { %v2128_v35 = vadd.f32 %v1550_v34, %v1036_v32 }
 0x1e0   : > { %1720 = vst [vmem:[%s3554_s7 + $0x50] sm:$0xff] %v2127_v33  ;;  %v1040_v36 = vpop.f32.mrb[12].mxu1 }
 0x1e1   : > { %1721 = vst.msk [vmem:[%s3554_s7 + $0x58] sm:$0xff] %vm1710_vm0, %v2128_v35  ;;  %v1554_v37 = vpop.f32.mrb[12].mxu0  ;;  %v1042_v38 = vpop.f32.mrb[13].mxu1 }
 0x1e2   : > { %v2129_v39 = vadd.f32 %v1554_v37, %v1040_v36  ;;  %v1556_v40 = vpop.f32.mrb[13].mxu0 }
 0x1e3   : > { %v2130_v41 = vadd.f32 %v1556_v40, %v1042_v38 }
 0x1e4   : > { %1722 = vst [vmem:[%s3554_s7 + $0x60] sm:$0xff] %v2129_v39  ;;  %v1046_v42 = vpop.f32.mrb[14].mxu1 }
 0x1e5   : > { %1723 = vst.msk [vmem:[%s3554_s7 + $0x68] sm:$0xff] %vm1710_vm0, %v2130_v41  ;;  %v1560_v43 = vpop.f32.mrb[14].mxu0  ;;  %v1048_v44 = vpop.f32.mrb[15].mxu1 }
 0x1e6   : > { %v2131_v45 = vadd.f32 %v1560_v43, %v1046_v42  ;;  %v1562_v46 = vpop.f32.mrb[15].mxu0 }
 0x1e7   : > { %v2132_v47 = vadd.f32 %v1562_v46, %v1048_v44 }
 0x1e8   : > { %1724 = vst [vmem:[%s3554_s7 + $0x70] sm:$0xff] %v2131_v45  ;;  %v1052_v48 = vpop.f32.mrb[16].mxu1 }
 0x1e9   : > { %1725 = vst.msk [vmem:[%s3554_s7 + $0x78] sm:$0xff] %vm1710_vm0, %v2132_v47  ;;  %v1566_v49 = vpop.f32.mrb[16].mxu0  ;;  %v1054_v50 = vpop.f32.mrb[17].mxu1 }
 0x1ea   : > { %v2133_v51 = vadd.f32 %v1566_v49, %v1052_v48  ;;  %v1568_v52 = vpop.f32.mrb[17].mxu0 }
 0x1eb   : > { %v2134_v53 = vadd.f32 %v1568_v52, %v1054_v50 }
 0x1ec   : > { %1726 = vst [vmem:[%s3554_s7 + $0x80] sm:$0xff] %v2133_v51  ;;  %v1058_v54 = vpop.f32.mrb[18].mxu1 }
 0x1ed   : > { %1727 = vst.msk [vmem:[%s3554_s7 + $0x88] sm:$0xff] %vm1710_vm0, %v2134_v53  ;;  %v1572_v55 = vpop.f32.mrb[18].mxu0  ;;  %v1060_v56 = vpop.f32.mrb[19].mxu1 }
 0x1ee   : > { %v2135_v57 = vadd.f32 %v1572_v55, %v1058_v54  ;;  %v1574_v58 = vpop.f32.mrb[19].mxu0 }
 0x1ef   : > { %v2136_v59 = vadd.f32 %v1574_v58, %v1060_v56 }
 0x1f0   : > { %1728 = vst [vmem:[%s3554_s7 + $0x90] sm:$0xff] %v2135_v57  ;;  %v1064_v60 = vpop.f32.mrb[20].mxu1 }
 0x1f1   : > { %1729 = vst.msk [vmem:[%s3554_s7 + $0x98] sm:$0xff] %vm1710_vm0, %v2136_v59  ;;  %v1578_v61 = vpop.f32.mrb[20].mxu0  ;;  %v1066_v62 = vpop.f32.mrb[21].mxu1 }
 0x1f2   : > { %v2137_v63 = vadd.f32 %v1578_v61, %v1064_v60  ;;  %v1580_v0 = vpop.f32.mrb[21].mxu0 }
 0x1f3   : > { %v2138_v1 = vadd.f32 %v1580_v0, %v1066_v62 }
 0x1f4   : > { %1730 = vst [vmem:[%s3554_s7 + $0xa0] sm:$0xff] %v2137_v63  ;;  %v1070_v2 = vpop.f32.mrb[22].mxu1 }
 0x1f5   : > { %1731 = vst.msk [vmem:[%s3554_s7 + $0xa8] sm:$0xff] %vm1710_vm0, %v2138_v1  ;;  %v1584_v3 = vpop.f32.mrb[22].mxu0  ;;  %v1072_v4 = vpop.f32.mrb[23].mxu1 }
 0x1f6   : > { %v2139_v5 = vadd.f32 %v1584_v3, %v1070_v2  ;;  %v1586_v6 = vpop.f32.mrb[23].mxu0 }
 0x1f7   : > { %v2140_v7 = vadd.f32 %v1586_v6, %v1072_v4 }
 0x1f8   : > { %1732 = vst [vmem:[%s3554_s7 + $0xb0] sm:$0xff] %v2139_v5  ;;  %v1076_v8 = vpop.f32.mrb[24].mxu1 }
 0x1f9   : > { %1733 = vst.msk [vmem:[%s3554_s7 + $0xb8] sm:$0xff] %vm1710_vm0, %v2140_v7  ;;  %v1590_v9 = vpop.f32.mrb[24].mxu0  ;;  %v1078_v10 = vpop.f32.mrb[25].mxu1 }
 0x1fa   : > { %v2141_v11 = vadd.f32 %v1590_v9, %v1076_v8  ;;  %v1592_v12 = vpop.f32.mrb[25].mxu0 }
 0x1fb   : > { %v2142_v13 = vadd.f32 %v1592_v12, %v1078_v10 }
 0x1fc   : > { %1734 = vst [vmem:[%s3554_s7 + $0xc0] sm:$0xff] %v2141_v11  ;;  %v1082_v14 = vpop.f32.mrb[26].mxu1 }
 0x1fd   : > { %1735 = vst.msk [vmem:[%s3554_s7 + $0xc8] sm:$0xff] %vm1710_vm0, %v2142_v13  ;;  %v1596_v15 = vpop.f32.mrb[26].mxu0  ;;  %v1084_v16 = vpop.f32.mrb[27].mxu1 }
 0x1fe   : > { %v2143_v17 = vadd.f32 %v1596_v15, %v1082_v14  ;;  %v1598_v18 = vpop.f32.mrb[27].mxu0 }
 0x1ff   : > { %v2144_v19 = vadd.f32 %v1598_v18, %v1084_v16 }
 0x200   : > { %1736 = vst [vmem:[%s3554_s7 + $0xd0] sm:$0xff] %v2143_v17  ;;  %v1088_v20 = vpop.f32.mrb[28].mxu1 }
 0x201   : > { %1737 = vst.msk [vmem:[%s3554_s7 + $0xd8] sm:$0xff] %vm1710_vm0, %v2144_v19  ;;  %v1602_v21 = vpop.f32.mrb[28].mxu0  ;;  %v1090_v22 = vpop.f32.mrb[29].mxu1 }
 0x202   : > { %v2145_v23 = vadd.f32 %v1602_v21, %v1088_v20  ;;  %v1604_v24 = vpop.f32.mrb[29].mxu0 }
 0x203   : > { %v2146_v25 = vadd.f32 %v1604_v24, %v1090_v22 }
 0x204   : > { %1738 = vst [vmem:[%s3554_s7 + $0xe0] sm:$0xff] %v2145_v23  ;;  %v1094_v26 = vpop.f32.mrb[30].mxu1 }
 0x205   : > { %1739 = vst.msk [vmem:[%s3554_s7 + $0xe8] sm:$0xff] %vm1710_vm0, %v2146_v25  ;;  %v1608_v27 = vpop.f32.mrb[30].mxu0  ;;  %v1096_v28 = vpop.f32.mrb[31].mxu1 }
 0x206   : > { %v2147_v29 = vadd.f32 %v1608_v27, %v1094_v26  ;;  %v1610_v30 = vpop.f32.mrb[31].mxu0 }
 0x207   : > { %v2148_v31 = vadd.f32 %v1610_v30, %v1096_v28 }
 0x208   : > { %1740 = vst [vmem:[%s3554_s7 + $0xf0] sm:$0xff] %v2147_v29  ;;  %v1100_v32 = vpop.f32.mrb[32].mxu1 }
 0x209   : > { %1741 = vst.msk [vmem:[%s3554_s7 + $0xf8] sm:$0xff] %vm1710_vm0, %v2148_v31  ;;  %v1614_v33 = vpop.f32.mrb[32].mxu0  ;;  %v1102_v34 = vpop.f32.mrb[33].mxu1 }
 0x20a   : > { %v2149_v35 = vadd.f32 %v1614_v33, %v1100_v32  ;;  %v1616_v36 = vpop.f32.mrb[33].mxu0 }
 0x20b   : > { %v2150_v37 = vadd.f32 %v1616_v36, %v1102_v34 }
 0x20c   : > { %1742 = vst [vmem:[%s3554_s7 + $0x100] sm:$0xff] %v2149_v35  ;;  %v1106_v38 = vpop.f32.mrb[34].mxu1 }
 0x20d   : > { %1743 = vst.msk [vmem:[%s3554_s7 + $0x108] sm:$0xff] %vm1710_vm0, %v2150_v37  ;;  %v1620_v39 = vpop.f32.mrb[34].mxu0  ;;  %v1108_v40 = vpop.f32.mrb[35].mxu1 }
 0x20e   : > { %v2151_v41 = vadd.f32 %v1620_v39, %v1106_v38  ;;  %v1622_v42 = vpop.f32.mrb[35].mxu0 }
 0x20f   : > { %v2152_v43 = vadd.f32 %v1622_v42, %v1108_v40 }
 0x210   : > { %1744 = vst [vmem:[%s3554_s7 + $0x110] sm:$0xff] %v2151_v41  ;;  %v1112_v44 = vpop.f32.mrb[36].mxu1 }
 0x211   : > { %1745 = vst.msk [vmem:[%s3554_s7 + $0x118] sm:$0xff] %vm1710_vm0, %v2152_v43  ;;  %v1626_v45 = vpop.f32.mrb[36].mxu0  ;;  %v1114_v46 = vpop.f32.mrb[37].mxu1 }
 0x212   : > { %v2153_v47 = vadd.f32 %v1626_v45, %v1112_v44  ;;  %v1628_v48 = vpop.f32.mrb[37].mxu0 }
 0x213   : > { %v2154_v49 = vadd.f32 %v1628_v48, %v1114_v46 }
 0x214   : > { %1746 = vst [vmem:[%s3554_s7 + $0x120] sm:$0xff] %v2153_v47  ;;  %v1118_v50 = vpop.f32.mrb[38].mxu1 }
 0x215   : > { %1747 = vst.msk [vmem:[%s3554_s7 + $0x128] sm:$0xff] %vm1710_vm0, %v2154_v49  ;;  %v1632_v51 = vpop.f32.mrb[38].mxu0  ;;  %v1120_v52 = vpop.f32.mrb[39].mxu1 }
 0x216   : > { %v2155_v53 = vadd.f32 %v1632_v51, %v1118_v50  ;;  %v1634_v54 = vpop.f32.mrb[39].mxu0 }
 0x217   : > { %v2156_v55 = vadd.f32 %v1634_v54, %v1120_v52 }
 0x218   : > { %1748 = vst [vmem:[%s3554_s7 + $0x130] sm:$0xff] %v2155_v53  ;;  %v1124_v56 = vpop.f32.mrb[40].mxu1 }
 0x219   : > { %1749 = vst.msk [vmem:[%s3554_s7 + $0x138] sm:$0xff] %vm1710_vm0, %v2156_v55  ;;  %v1638_v57 = vpop.f32.mrb[40].mxu0  ;;  %v1126_v58 = vpop.f32.mrb[41].mxu1 }
 0x21a   : > { %v2157_v59 = vadd.f32 %v1638_v57, %v1124_v56  ;;  %v1640_v60 = vpop.f32.mrb[41].mxu0 }
 0x21b   : > { %v2158_v61 = vadd.f32 %v1640_v60, %v1126_v58 }
 0x21c   : > { %1750 = vst [vmem:[%s3554_s7 + $0x140] sm:$0xff] %v2157_v59  ;;  %v1130_v62 = vpop.f32.mrb[42].mxu1 }
 0x21d   : > { %1751 = vst.msk [vmem:[%s3554_s7 + $0x148] sm:$0xff] %vm1710_vm0, %v2158_v61  ;;  %v1644_v63 = vpop.f32.mrb[42].mxu0  ;;  %v1132_v0 = vpop.f32.mrb[43].mxu1 }
 0x21e   : > { %v2159_v1 = vadd.f32 %v1644_v63, %v1130_v62  ;;  %v1646_v2 = vpop.f32.mrb[43].mxu0 }
 0x21f   : > { %v2160_v3 = vadd.f32 %v1646_v2, %v1132_v0 }
 0x220   : > { %1752 = vst [vmem:[%s3554_s7 + $0x150] sm:$0xff] %v2159_v1  ;;  %v1136_v4 = vpop.f32.mrb[44].mxu1 }
 0x221   : > { %1753 = vst.msk [vmem:[%s3554_s7 + $0x158] sm:$0xff] %vm1710_vm0, %v2160_v3  ;;  %v1650_v5 = vpop.f32.mrb[44].mxu0  ;;  %v1138_v6 = vpop.f32.mrb[45].mxu1 }
 0x222   : > { %v2161_v7 = vadd.f32 %v1650_v5, %v1136_v4  ;;  %v1652_v8 = vpop.f32.mrb[45].mxu0 }
 0x223   : > { %v2162_v9 = vadd.f32 %v1652_v8, %v1138_v6 }
 0x224   : > { %1754 = vst [vmem:[%s3554_s7 + $0x160] sm:$0xff] %v2161_v7  ;;  %v1142_v10 = vpop.f32.mrb[46].mxu1 }
 0x225   : > { %1755 = vst.msk [vmem:[%s3554_s7 + $0x168] sm:$0xff] %vm1710_vm0, %v2162_v9  ;;  %v1656_v11 = vpop.f32.mrb[46].mxu0  ;;  %v1144_v12 = vpop.f32.mrb[47].mxu1 }
 0x226   : > { %v2163_v13 = vadd.f32 %v1656_v11, %v1142_v10  ;;  %v1658_v14 = vpop.f32.mrb[47].mxu0 }
 0x227   : > { %v2164_v15 = vadd.f32 %v1658_v14, %v1144_v12 }
 0x228   : > { %1756 = vst [vmem:[%s3554_s7 + $0x170] sm:$0xff] %v2163_v13  ;;  %v1148_v16 = vpop.f32.mrb[48].mxu1 }
 0x229   : > { %1757 = vst.msk [vmem:[%s3554_s7 + $0x178] sm:$0xff] %vm1710_vm0, %v2164_v15  ;;  %v1662_v17 = vpop.f32.mrb[48].mxu0  ;;  %v1150_v18 = vpop.f32.mrb[49].mxu1 }
 0x22a   : > { %v2165_v19 = vadd.f32 %v1662_v17, %v1148_v16  ;;  %v1664_v20 = vpop.f32.mrb[49].mxu0 }
 0x22b   : > { %v2166_v21 = vadd.f32 %v1664_v20, %v1150_v18 }
 0x22c   : > { %1758 = vst [vmem:[%s3554_s7 + $0x180] sm:$0xff] %v2165_v19  ;;  %v1154_v22 = vpop.f32.mrb[50].mxu1 }
 0x22d   : > { %1759 = vst.msk [vmem:[%s3554_s7 + $0x188] sm:$0xff] %vm1710_vm0, %v2166_v21  ;;  %v1668_v23 = vpop.f32.mrb[50].mxu0  ;;  %v1156_v24 = vpop.f32.mrb[51].mxu1 }
 0x22e   : > { %v2167_v25 = vadd.f32 %v1668_v23, %v1154_v22  ;;  %v1670_v26 = vpop.f32.mrb[51].mxu0 }
 0x22f   : > { %v2168_v27 = vadd.f32 %v1670_v26, %v1156_v24 }
 0x230   : > { %1760 = vst [vmem:[%s3554_s7 + $0x190] sm:$0xff] %v2167_v25  ;;  %v1160_v28 = vpop.f32.mrb[52].mxu1 }
 0x231   : > { %1761 = vst.msk [vmem:[%s3554_s7 + $0x198] sm:$0xff] %vm1710_vm0, %v2168_v27  ;;  %v1674_v29 = vpop.f32.mrb[52].mxu0  ;;  %v1162_v30 = vpop.f32.mrb[53].mxu1 }
 0x232   : > { %v2169_v31 = vadd.f32 %v1674_v29, %v1160_v28  ;;  %v1676_v32 = vpop.f32.mrb[53].mxu0 }
 0x233   : > { %v2170_v33 = vadd.f32 %v1676_v32, %v1162_v30 }
 0x234   : > { %1762 = vst [vmem:[%s3554_s7 + $0x1a0] sm:$0xff] %v2169_v31  ;;  %v1166_v34 = vpop.f32.mrb[54].mxu1 }
 0x235   : > { %1763 = vst.msk [vmem:[%s3554_s7 + $0x1a8] sm:$0xff] %vm1710_vm0, %v2170_v33  ;;  %v1680_v35 = vpop.f32.mrb[54].mxu0  ;;  %v1168_v36 = vpop.f32.mrb[55].mxu1 }
 0x236   : > { %v2171_v37 = vadd.f32 %v1680_v35, %v1166_v34  ;;  %v1682_v38 = vpop.f32.mrb[55].mxu0 }
 0x237   : > { %v2172_v39 = vadd.f32 %v1682_v38, %v1168_v36 }
 0x238   : > { %1764 = vst [vmem:[%s3554_s7 + $0x1b0] sm:$0xff] %v2171_v37  ;;  %v1172_v40 = vpop.f32.mrb[56].mxu1 }
 0x239   : > { %1765 = vst.msk [vmem:[%s3554_s7 + $0x1b8] sm:$0xff] %vm1710_vm0, %v2172_v39  ;;  %v1686_v41 = vpop.f32.mrb[56].mxu0  ;;  %v1174_v42 = vpop.f32.mrb[57].mxu1 }
 0x23a   : > { %v2173_v43 = vadd.f32 %v1686_v41, %v1172_v40  ;;  %v1688_v44 = vpop.f32.mrb[57].mxu0 }
 0x23b   : > { %v2174_v45 = vadd.f32 %v1688_v44, %v1174_v42 }
 0x23c   : > { %1766 = vst [vmem:[%s3554_s7 + $0x1c0] sm:$0xff] %v2173_v43  ;;  %v1178_v46 = vpop.f32.mrb[58].mxu1 }
 0x23d   : > { %1767 = vst.msk [vmem:[%s3554_s7 + $0x1c8] sm:$0xff] %vm1710_vm0, %v2174_v45  ;;  %v1692_v47 = vpop.f32.mrb[58].mxu0  ;;  %v1180_v48 = vpop.f32.mrb[59].mxu1 }
 0x23e   : > { %v2175_v49 = vadd.f32 %v1692_v47, %v1178_v46  ;;  %v1694_v50 = vpop.f32.mrb[59].mxu0 }
 0x23f   : > { %v2176_v51 = vadd.f32 %v1694_v50, %v1180_v48 }
 0x240   : > { %1768 = vst [vmem:[%s3554_s7 + $0x1d0] sm:$0xff] %v2175_v49  ;;  %v1184_v52 = vpop.f32.mrb[60].mxu1 }
 0x241   : > { %1769 = vst.msk [vmem:[%s3554_s7 + $0x1d8] sm:$0xff] %vm1710_vm0, %v2176_v51  ;;  %v1698_v53 = vpop.f32.mrb[60].mxu0  ;;  %v1186_v54 = vpop.f32.mrb[61].mxu1 }
 0x242   : > { %v2177_v55 = vadd.f32 %v1698_v53, %v1184_v52  ;;  %v1700_v56 = vpop.f32.mrb[61].mxu0 }
 0x243   : > { %v2178_v57 = vadd.f32 %v1700_v56, %v1186_v54 }
 0x244   : > { %1770 = vst [vmem:[%s3554_s7 + $0x1e0] sm:$0xff] %v2177_v55  ;;  %v1190_v58 = vpop.f32.mrb[62].mxu1 }
 0x245   : > { %1771 = vst.msk [vmem:[%s3554_s7 + $0x1e8] sm:$0xff] %vm1710_vm0, %v2178_v57  ;;  %v1704_v59 = vpop.f32.mrb[62].mxu0  ;;  %v1192_v60 = vpop.f32.mrb[63].mxu1 }
 0x246   : > { %v2179_v61 = vadd.f32 %v1704_v59, %v1190_v58  ;;  %v1706_v62 = vpop.f32.mrb[63].mxu0 }
 0x247   : > { %v2180_v63 = vadd.f32 %v1706_v62, %v1192_v60 }
 0x248   : > { %1772 = vst [vmem:[%s3554_s7 + $0x1f0] sm:$0xff] %v2179_v61 }
 0x249   : > { %1773 = vst.msk [vmem:[%s3554_s7 + $0x1f8] sm:$0xff] %vm1710_vm0, %v2180_v63 }
 0x24a PF: > { %p12_p8 = scmp.ge.s32.totalorder %s2454_s14, 4   ;;  %s3671_s9 = smov %s2406_s10 }
 0x24b   : > { %s3672_s10 = smov %s2410_s11  ;;  %s3673_s11 = smov %s2464_s17 }
 0x24c   : > { %s3674_s12 = smov %s2454_s14  ;;  %14 = sbr.rel (!%p12_p8) target bundleno = 3 (0x3), region = 68 }
 0x253   :  { %1798 = vsyncpa [#allocation3], 1 }
 0x254   :  { %1800 = vsyncpa [#allocation3 + $0x1], 1 }

</bundles_post_ra>
